<compile_context>
chip_gen: v6e
topology: v6e:2x2x1
jax: 0.10.0
libtpu: 0.0.40
codegen_flags: <defaults>
</compile_context>

<pallas_src>
import functools
import math

import jax
import jax.numpy as jnp
from jax import lax
from jax.experimental import pallas as pl
from jax.experimental.pallas import tpu as pltpu


def _encoder_layer_kernel(x_ref, wq_ref, bq_ref, wk_ref, bk_ref, wv_ref, bv_ref,
                          wo_ref, bo_ref, w1_ref, b1_ref, w2_ref, b2_ref, o_ref,
                          *, d_model, nhead, seq_len, block_batch,
                          mm_dtype, approx_recip):
    """One grid step: a block of `block_batch` batch elements, x_ref is (B, L, E)."""
    hd = d_model // nhead
    M = block_batch * seq_len

    x = x_ref[...]                                   # (B, L, E) f32
    xf = x.reshape(M, d_model)                       # (M, E)    f32 (kept for residual)
    xm = xf.astype(mm_dtype)

    # --- in-projection: q, k, v (weights pre-transposed; scale folded into wq/bq) --
    q = jnp.dot(xm, wq_ref[...], preferred_element_type=jnp.float32) + bq_ref[...]
    k = jnp.dot(xm, wk_ref[...], preferred_element_type=jnp.float32) + bk_ref[...]
    v = jnp.dot(xm, wv_ref[...], preferred_element_type=jnp.float32) + bv_ref[...]

    wo_t = wo_ref[...]                               # (E, E) mm_dtype, pre-transposed

    # --- per-(batch, head) scaled dot-product attention ---------------------------
    # Head outputs are folded directly into the output projection (no concatenate).
    attn_rows = []
    for b in range(block_batch):                     # static, small
        r0 = b * seq_len
        acc = jnp.zeros((seq_len, d_model), jnp.float32)
        for h in range(nhead):                       # static, small
            c0 = h * hd
            qs = q[r0:r0 + seq_len, c0:c0 + hd].astype(mm_dtype)   # (L, hd)
            ks = k[r0:r0 + seq_len, c0:c0 + hd].astype(mm_dtype)   # (L, hd)
            vs = v[r0:r0 + seq_len, c0:c0 + hd].astype(mm_dtype)   # (L, hd)

            # scores: contract last dims of q and k (no explicit transpose)
            s = lax.dot_general(qs, ks, (((1,), (1,)), ((), ())),
                                preferred_element_type=jnp.float32)  # (L, L) f32
            s = s - jnp.max(s, axis=-1, keepdims=True)
            p = jnp.exp(s)
            denom = jnp.sum(p, axis=-1, keepdims=True)
            p = p * pl.reciprocal(denom, approx=approx_recip)

            oh = jnp.dot(p.astype(mm_dtype), vs,
                         preferred_element_type=jnp.float32)         # (L, hd) f32
            # fold into output projection: head_h @ Wo_t[c0:c0+hd, :]
            acc = acc + jnp.dot(oh.astype(mm_dtype), wo_t[c0:c0 + hd, :],
                                preferred_element_type=jnp.float32)  # (L, E) f32
        attn_rows.append(acc)
    attn_out = attn_rows[0] if block_batch == 1 else jnp.concatenate(attn_rows, axis=0)

    # --- output projection bias + residual -----------------------------------------
    src1 = xf + attn_out + bo_ref[...]               # (M, E) f32

    # --- feed-forward + residual ----------------------------------------------------
    # nn.LeakyReLU(True) means negative_slope=1.0, i.e. identity -> dropped (no-op).
    h1 = jnp.dot(src1.astype(mm_dtype), w1_ref[...],
                 preferred_element_type=jnp.float32) + b1_ref[...]   # (M, F) f32
    src2 = jnp.dot(h1.astype(mm_dtype), w2_ref[...],
                   preferred_element_type=jnp.float32) + b2_ref[...] # (M, E) f32

    out = src1 + src2
    o_ref[...] = out.reshape(block_batch, seq_len, d_model).astype(o_ref.dtype)


def _choose_block_batch(n_batch, seq_len, target_rows=512):
    """Largest divisor of n_batch keeping block rows (B*L) at or below target."""
    best = 1
    for d in range(1, n_batch + 1):
        if n_batch % d == 0 and d * seq_len <= target_rows:
            best = d
    return best


def transformer_encoder_layer(src, params, *, nhead,
                              matmul_dtype=jnp.bfloat16, block_batch=None):
    """src: (L, N, E) float32. Returns (L, N, E) float32."""
    L, N, E = src.shape
    Fdim = params["w1"].shape[0]
    hd = E // nhead
    scale = 1.0 / math.sqrt(hd)

    mm_dtype = jnp.dtype(matmul_dtype)
    approx_recip = mm_dtype != jnp.dtype(jnp.float32)

    # --- one-time weight prep: split qkv, transpose, fold scale, cast --------------
    wi, bi = params["wi"], params["bi"]                        # (3E, E), (3E,)
    wq_t = (wi[0:E] * scale).T.astype(mm_dtype)                # (E, E)
    wk_t = wi[E:2 * E].T.astype(mm_dtype)                      # (E, E)
    wv_t = wi[2 * E:3 * E].T.astype(mm_dtype)                  # (E, E)
    bq = (bi[0:E] * scale).reshape(1, E).astype(jnp.float32)
    bk = bi[E:2 * E].reshape(1, E).astype(jnp.float32)
    bv = bi[2 * E:3 * E].reshape(1, E).astype(jnp.float32)
    wo_t = params["wo"].T.astype(mm_dtype)                     # (E, E)
    bo = params["bo"].reshape(1, E).astype(jnp.float32)
    w1_t = params["w1"].T.astype(mm_dtype)                     # (E, F)
    b1 = params["b1"].reshape(1, Fdim).astype(jnp.float32)
    w2_t = params["w2"].T.astype(mm_dtype)                     # (F, E)
    b2 = params["b2"].reshape(1, E).astype(jnp.float32)

    x = jnp.transpose(src, (1, 0, 2))                          # (N, L, E)

    if block_batch is None:
        block_batch = _choose_block_batch(N, L)
    assert N % block_batch == 0, "block_batch must divide batch size"
    grid = (N // block_batch,)

    kernel = functools.partial(
        _encoder_layer_kernel,
        d_model=E, nhead=nhead, seq_len=L, block_batch=block_batch,
        mm_dtype=mm_dtype, approx_recip=approx_recip)

    def _rep2(i):      # grid-invariant 2-D operand
        return (0, 0)

    out = pl.pallas_call(
        kernel,
        out_shape=jax.ShapeDtypeStruct((N, L, E), src.dtype),
        grid=grid,
        in_specs=[
            pl.BlockSpec((block_batch, L, E), lambda b: (b, 0, 0)),   # x block
            pl.BlockSpec((E, E), _rep2),                              # wq_t
            pl.BlockSpec((1, E), _rep2),                              # bq
            pl.BlockSpec((E, E), _rep2),                              # wk_t
            pl.BlockSpec((1, E), _rep2),                              # bk
            pl.BlockSpec((E, E), _rep2),                              # wv_t
            pl.BlockSpec((1, E), _rep2),                              # bv
            pl.BlockSpec((E, E), _rep2),                              # wo_t
            pl.BlockSpec((1, E), _rep2),                              # bo
            pl.BlockSpec((E, Fdim), _rep2),                           # w1_t
            pl.BlockSpec((1, Fdim), _rep2),                           # b1
            pl.BlockSpec((Fdim, E), _rep2),                           # w2_t
            pl.BlockSpec((1, E), _rep2),                              # b2
        ],
        out_specs=pl.BlockSpec((block_batch, L, E), lambda b: (b, 0, 0)),
        compiler_params=pltpu.CompilerParams(
            dimension_semantics=("parallel",),        # batch blocks independent (v7x 2 TCs)
            vmem_limit_bytes=64 * 1024 * 1024,        # explicit VMEM budget
        ),
    )(
        x,
        wq_t, bq, wk_t, bk, wv_t, bv,
        wo_t, bo, w1_t, b1, w2_t, b2,
    )

    return jnp.transpose(out, (1, 0, 2))              # back to (L, N, E)


def _reference(src, params, nhead):
    """Pure-JAX f32 reference reproducing PyTorch semantics (dropout=0)."""
    L, N, E = src.shape
    hd = E // nhead
    x = src
    qkv = jnp.einsum("lne,fe->lnf", x, params["wi"]) + params["bi"]
    q, k, v = qkv[..., :E], qkv[..., E:2 * E], qkv[..., 2 * E:]
    q = q.reshape(L, N, nhead, hd) / math.sqrt(hd)
    k = k.reshape(L, N, nhead, hd)
    v = v.reshape(L, N, nhead, hd)
    s = jnp.einsum("lnhd,mnhd->nhlm", q, k)
    p = jax.nn.softmax(s, axis=-1)
    attn = jnp.einsum("nhlm,mnhd->lnhd", p, v).reshape(L, N, E)
    attn = jnp.einsum("lne,fe->lnf", attn, params["wo"]) + params["bo"]
    src1 = x + attn
    h1 = jnp.einsum("lne,fe->lnf", src1, params["w1"]) + params["b1"]
    h1 = jnp.where(h1 >= 0, h1, 1.0 * h1)             # LeakyReLU slope 1.0 == identity
    src2 = jnp.einsum("lnf,ef->lne", h1, params["w2"]) + params["b2"]
    return src1 + src2


def _init_params(key, d_model, nhead, dim_feedforward):
    ks = jax.random.split(key, 8)
    scale = 0.1
    return {
        "wi": scale * jax.random.normal(ks[0], (3 * d_model, d_model), jnp.float32),
        "bi": scale * jax.random.normal(ks[1], (3 * d_model,), jnp.float32),
        "wo": scale * jax.random.normal(ks[2], (d_model, d_model), jnp.float32),
        "bo": scale * jax.random.normal(ks[3], (d_model,), jnp.float32),
        "w1": scale * jax.random.normal(ks[4], (dim_feedforward, d_model), jnp.float32),
        "b1": scale * jax.random.normal(ks[5], (dim_feedforward,), jnp.float32),
        "w2": scale * jax.random.normal(ks[6], (d_model, dim_feedforward), jnp.float32),
        "b2": scale * jax.random.normal(ks[7], (d_model,), jnp.float32),
    }


if __name__ == "__main__":
    L, N, E = 8, 2, 32            # seq_len, batch, d_model
    NHEAD = 4
    FF = 16                       # dim_feedforward (module default)

    key = jax.random.PRNGKey(0)
    k_src, k_par = jax.random.split(key)
    src = jax.random.normal(k_src, (L, N, E), jnp.float32)
    params = _init_params(k_par, E, NHEAD, FF)

    ref = _reference(src, params, NHEAD)

    # Exact path: f32 MXU matmuls, exact reciprocal — tight tolerance.
    out_f32 = transformer_encoder_layer(src, params, nhead=NHEAD,
                                        matmul_dtype=jnp.float32)
    out_f32 = jax.block_until_ready(out_f32)
    assert out_f32.shape == (L, N, E)
    assert jnp.allclose(out_f32, ref, atol=1e-5, rtol=1e-5), \
        f"f32 max err {jnp.max(jnp.abs(out_f32 - ref))}"

    # Performance path: bf16 MXU matmuls with f32 accumulation / softmax stats.
    out_bf16 = transformer_encoder_layer(src, params, nhead=NHEAD,
                                         matmul_dtype=jnp.bfloat16)
    out_bf16 = jax.block_until_ready(out_bf16)
    assert out_bf16.shape == (L, N, E)
    assert jnp.allclose(out_bf16, ref, atol=5e-2, rtol=5e-2), \
        f"bf16 max err {jnp.max(jnp.abs(out_bf16 - ref))}"

    print("KERNEL_OK")
</pallas_src>

<mosaic_0001>
module attributes {stable_mosaic.version = 11 : i64} {
  func.func @_encoder_layer_kernel(%arg0: i32, %arg1: memref<2x8x32xf32, #tpu.memory_space<vmem>>, %arg2: memref<32x32xf32, #tpu.memory_space<vmem>>, %arg3: memref<1x32xf32, #tpu.memory_space<vmem>>, %arg4: memref<32x32xf32, #tpu.memory_space<vmem>>, %arg5: memref<1x32xf32, #tpu.memory_space<vmem>>, %arg6: memref<32x32xf32, #tpu.memory_space<vmem>>, %arg7: memref<1x32xf32, #tpu.memory_space<vmem>>, %arg8: memref<32x32xf32, #tpu.memory_space<vmem>>, %arg9: memref<1x32xf32, #tpu.memory_space<vmem>>, %arg10: memref<32x16xf32, #tpu.memory_space<vmem>>, %arg11: memref<1x16xf32, #tpu.memory_space<vmem>>, %arg12: memref<16x32xf32, #tpu.memory_space<vmem>>, %arg13: memref<1x32xf32, #tpu.memory_space<vmem>>, %arg14: memref<2x8x32xf32, #tpu.memory_space<vmem>>) attributes {dimension_semantics = [#tpu.dimension_semantics<parallel>], iteration_bounds = array<i64: 1>, scalar_prefetch = 0 : i64, scratch_operands = 0 : i64, tpu.core_type = #tpu.core_type<tc>, window_params = [{transform_indices = @transform_0, window_bounds = array<i64: 2, 8, 32>}, {pipeline_mode = #tpu.pipeline_mode<synchronous>, transform_indices = @transform_1, window_bounds = array<i64: 32, 32>}, {pipeline_mode = #tpu.pipeline_mode<synchronous>, transform_indices = @transform_2, window_bounds = array<i64: 1, 32>}, {pipeline_mode = #tpu.pipeline_mode<synchronous>, transform_indices = @transform_3, window_bounds = array<i64: 32, 32>}, {pipeline_mode = #tpu.pipeline_mode<synchronous>, transform_indices = @transform_4, window_bounds = array<i64: 1, 32>}, {pipeline_mode = #tpu.pipeline_mode<synchronous>, transform_indices = @transform_5, window_bounds = array<i64: 32, 32>}, {pipeline_mode = #tpu.pipeline_mode<synchronous>, transform_indices = @transform_6, window_bounds = array<i64: 1, 32>}, {pipeline_mode = #tpu.pipeline_mode<synchronous>, transform_indices = @transform_7, window_bounds = array<i64: 32, 32>}, {pipeline_mode = #tpu.pipeline_mode<synchronous>, transform_indices = @transform_8, window_bounds = array<i64: 1, 32>}, {pipeline_mode = #tpu.pipeline_mode<synchronous>, transform_indices = @transform_9, window_bounds = array<i64: 32, 16>}, {pipeline_mode = #tpu.pipeline_mode<synchronous>, transform_indices = @transform_10, window_bounds = array<i64: 1, 16>}, {pipeline_mode = #tpu.pipeline_mode<synchronous>, transform_indices = @transform_11, window_bounds = array<i64: 16, 32>}, {pipeline_mode = #tpu.pipeline_mode<synchronous>, transform_indices = @transform_12, window_bounds = array<i64: 1, 32>}, {transform_indices = @transform_13, window_bounds = array<i64: 2, 8, 32>}]} {
    %c0 = arith.constant 0 : index
    %c0_0 = arith.constant 0 : index
    %c0_1 = arith.constant 0 : index
    %0 = vector.load %arg1[%c0, %c0_0, %c0_1] : memref<2x8x32xf32, #tpu.memory_space<vmem>>, vector<2x8x32xf32>
    %1 = vector.shape_cast %0 : vector<2x8x32xf32> to vector<16x32xf32>
    %c0_2 = arith.constant 0 : index
    %c0_3 = arith.constant 0 : index
    %2 = vector.load %arg2[%c0_2, %c0_3] : memref<32x32xf32, #tpu.memory_space<vmem>>, vector<32x32xf32>
    %cst = arith.constant dense<0.000000e+00> : vector<16x32xf32>
    %3 = tpu.matmul %1, %2, %cst {dimension_numbers = #tpu.dot_dimension_numbers<[1], [0], [0], [1], [0, 0, 1, 1], [], []>} : vector<16x32xf32>, vector<32x32xf32>, vector<16x32xf32> -> vector<16x32xf32>
    %c0_4 = arith.constant 0 : index
    %c0_5 = arith.constant 0 : index
    %4 = vector.load %arg3[%c0_4, %c0_5] : memref<1x32xf32, #tpu.memory_space<vmem>>, vector<1x32xf32>
    %5 = vector.broadcast %4 : vector<1x32xf32> to vector<16x32xf32>
    %6 = arith.addf %3, %5 : vector<16x32xf32>
    %c0_6 = arith.constant 0 : index
    %c0_7 = arith.constant 0 : index
    %7 = vector.load %arg4[%c0_6, %c0_7] : memref<32x32xf32, #tpu.memory_space<vmem>>, vector<32x32xf32>
    %cst_8 = arith.constant dense<0.000000e+00> : vector<16x32xf32>
    %8 = tpu.matmul %1, %7, %cst_8 {dimension_numbers = #tpu.dot_dimension_numbers<[1], [0], [0], [1], [0, 0, 1, 1], [], []>} : vector<16x32xf32>, vector<32x32xf32>, vector<16x32xf32> -> vector<16x32xf32>
    %c0_9 = arith.constant 0 : index
    %c0_10 = arith.constant 0 : index
    %9 = vector.load %arg5[%c0_9, %c0_10] : memref<1x32xf32, #tpu.memory_space<vmem>>, vector<1x32xf32>
    %10 = vector.broadcast %9 : vector<1x32xf32> to vector<16x32xf32>
    %11 = arith.addf %8, %10 : vector<16x32xf32>
    %c0_11 = arith.constant 0 : index
    %c0_12 = arith.constant 0 : index
    %12 = vector.load %arg6[%c0_11, %c0_12] : memref<32x32xf32, #tpu.memory_space<vmem>>, vector<32x32xf32>
    %cst_13 = arith.constant dense<0.000000e+00> : vector<16x32xf32>
    %13 = tpu.matmul %1, %12, %cst_13 {dimension_numbers = #tpu.dot_dimension_numbers<[1], [0], [0], [1], [0, 0, 1, 1], [], []>} : vector<16x32xf32>, vector<32x32xf32>, vector<16x32xf32> -> vector<16x32xf32>
    %c0_14 = arith.constant 0 : index
    %c0_15 = arith.constant 0 : index
    %14 = vector.load %arg7[%c0_14, %c0_15] : memref<1x32xf32, #tpu.memory_space<vmem>>, vector<1x32xf32>
    %15 = vector.broadcast %14 : vector<1x32xf32> to vector<16x32xf32>
    %16 = arith.addf %13, %15 : vector<16x32xf32>
    %c0_16 = arith.constant 0 : index
    %c0_17 = arith.constant 0 : index
    %17 = vector.load %arg8[%c0_16, %c0_17] : memref<32x32xf32, #tpu.memory_space<vmem>>, vector<32x32xf32>
    %cst_18 = arith.constant 0.000000e+00 : f32
    %18 = vector.broadcast %cst_18 : f32 to vector<8x32xf32>
    %19 = vector.extract_strided_slice %6 {offsets = [0, 0], sizes = [8, 8], strides = [1, 1]} : vector<16x32xf32> to vector<8x8xf32>
    %20 = vector.extract_strided_slice %11 {offsets = [0, 0], sizes = [8, 8], strides = [1, 1]} : vector<16x32xf32> to vector<8x8xf32>
    %21 = vector.extract_strided_slice %16 {offsets = [0, 0], sizes = [8, 8], strides = [1, 1]} : vector<16x32xf32> to vector<8x8xf32>
    %cst_19 = arith.constant dense<0.000000e+00> : vector<8x8xf32>
    %22 = tpu.matmul %19, %20, %cst_19 {dimension_numbers = #tpu.dot_dimension_numbers<[1], [1], [0], [0], [0, 0, 1, 0], [], []>} : vector<8x8xf32>, vector<8x8xf32>, vector<8x8xf32> -> vector<8x8xf32>
    %cst_20 = arith.constant dense<0xFF800000> : vector<8xf32>
    %23 = vector.multi_reduction <maximumf>, %22, %cst_20 [1] : vector<8x8xf32> to vector<8xf32>
    %24 = vector.shape_cast %23 : vector<8xf32> to vector<8x1xf32>
    %25 = vector.broadcast %24 : vector<8x1xf32> to vector<8x8xf32>
    %26 = arith.subf %22, %25 : vector<8x8xf32>
    %27 = math.exp %26 : vector<8x8xf32>
    %cst_21 = arith.constant dense<0.000000e+00> : vector<8xf32>
    %28 = vector.multi_reduction <add>, %27, %cst_21 [1] : vector<8x8xf32> to vector<8xf32>
    %29 = vector.shape_cast %28 : vector<8xf32> to vector<8x1xf32>
    %30 = tpu.reciprocal %29 : vector<8x1xf32> -> vector<8x1xf32>
    %31 = vector.broadcast %30 : vector<8x1xf32> to vector<8x8xf32>
    %32 = arith.mulf %27, %31 : vector<8x8xf32>
    %cst_22 = arith.constant dense<0.000000e+00> : vector<8x8xf32>
    %33 = tpu.matmul %32, %21, %cst_22 {dimension_numbers = #tpu.dot_dimension_numbers<[1], [0], [0], [1], [0, 0, 1, 1], [], []>} : vector<8x8xf32>, vector<8x8xf32>, vector<8x8xf32> -> vector<8x8xf32>
    %34 = vector.extract_strided_slice %17 {offsets = [0, 0], sizes = [8, 32], strides = [1, 1]} : vector<32x32xf32> to vector<8x32xf32>
    %cst_23 = arith.constant dense<0.000000e+00> : vector<8x32xf32>
    %35 = tpu.matmul %33, %34, %cst_23 {dimension_numbers = #tpu.dot_dimension_numbers<[1], [0], [0], [1], [0, 0, 1, 1], [], []>} : vector<8x8xf32>, vector<8x32xf32>, vector<8x32xf32> -> vector<8x32xf32>
    %36 = arith.addf %18, %35 : vector<8x32xf32>
    %37 = vector.extract_strided_slice %6 {offsets = [0, 8], sizes = [8, 8], strides = [1, 1]} : vector<16x32xf32> to vector<8x8xf32>
    %38 = vector.extract_strided_slice %11 {offsets = [0, 8], sizes = [8, 8], strides = [1, 1]} : vector<16x32xf32> to vector<8x8xf32>
    %39 = vector.extract_strided_slice %16 {offsets = [0, 8], sizes = [8, 8], strides = [1, 1]} : vector<16x32xf32> to vector<8x8xf32>
    %cst_24 = arith.constant dense<0.000000e+00> : vector<8x8xf32>
    %40 = tpu.matmul %37, %38, %cst_24 {dimension_numbers = #tpu.dot_dimension_numbers<[1], [1], [0], [0], [0, 0, 1, 0], [], []>} : vector<8x8xf32>, vector<8x8xf32>, vector<8x8xf32> -> vector<8x8xf32>
    %cst_25 = arith.constant dense<0xFF800000> : vector<8xf32>
    %41 = vector.multi_reduction <maximumf>, %40, %cst_25 [1] : vector<8x8xf32> to vector<8xf32>
    %42 = vector.shape_cast %41 : vector<8xf32> to vector<8x1xf32>
    %43 = vector.broadcast %42 : vector<8x1xf32> to vector<8x8xf32>
    %44 = arith.subf %40, %43 : vector<8x8xf32>
    %45 = math.exp %44 : vector<8x8xf32>
    %cst_26 = arith.constant dense<0.000000e+00> : vector<8xf32>
    %46 = vector.multi_reduction <add>, %45, %cst_26 [1] : vector<8x8xf32> to vector<8xf32>
    %47 = vector.shape_cast %46 : vector<8xf32> to vector<8x1xf32>
    %48 = tpu.reciprocal %47 : vector<8x1xf32> -> vector<8x1xf32>
    %49 = vector.broadcast %48 : vector<8x1xf32> to vector<8x8xf32>
    %50 = arith.mulf %45, %49 : vector<8x8xf32>
    %cst_27 = arith.constant dense<0.000000e+00> : vector<8x8xf32>
    %51 = tpu.matmul %50, %39, %cst_27 {dimension_numbers = #tpu.dot_dimension_numbers<[1], [0], [0], [1], [0, 0, 1, 1], [], []>} : vector<8x8xf32>, vector<8x8xf32>, vector<8x8xf32> -> vector<8x8xf32>
    %52 = vector.extract_strided_slice %17 {offsets = [8, 0], sizes = [8, 32], strides = [1, 1]} : vector<32x32xf32> to vector<8x32xf32>
    %cst_28 = arith.constant dense<0.000000e+00> : vector<8x32xf32>
    %53 = tpu.matmul %51, %52, %cst_28 {dimension_numbers = #tpu.dot_dimension_numbers<[1], [0], [0], [1], [0, 0, 1, 1], [], []>} : vector<8x8xf32>, vector<8x32xf32>, vector<8x32xf32> -> vector<8x32xf32>
    %54 = arith.addf %36, %53 : vector<8x32xf32>
    %55 = vector.extract_strided_slice %6 {offsets = [0, 16], sizes = [8, 8], strides = [1, 1]} : vector<16x32xf32> to vector<8x8xf32>
    %56 = vector.extract_strided_slice %11 {offsets = [0, 16], sizes = [8, 8], strides = [1, 1]} : vector<16x32xf32> to vector<8x8xf32>
    %57 = vector.extract_strided_slice %16 {offsets = [0, 16], sizes = [8, 8], strides = [1, 1]} : vector<16x32xf32> to vector<8x8xf32>
    %cst_29 = arith.constant dense<0.000000e+00> : vector<8x8xf32>
    %58 = tpu.matmul %55, %56, %cst_29 {dimension_numbers = #tpu.dot_dimension_numbers<[1], [1], [0], [0], [0, 0, 1, 0], [], []>} : vector<8x8xf32>, vector<8x8xf32>, vector<8x8xf32> -> vector<8x8xf32>
    %cst_30 = arith.constant dense<0xFF800000> : vector<8xf32>
    %59 = vector.multi_reduction <maximumf>, %58, %cst_30 [1] : vector<8x8xf32> to vector<8xf32>
    %60 = vector.shape_cast %59 : vector<8xf32> to vector<8x1xf32>
    %61 = vector.broadcast %60 : vector<8x1xf32> to vector<8x8xf32>
    %62 = arith.subf %58, %61 : vector<8x8xf32>
    %63 = math.exp %62 : vector<8x8xf32>
    %cst_31 = arith.constant dense<0.000000e+00> : vector<8xf32>
    %64 = vector.multi_reduction <add>, %63, %cst_31 [1] : vector<8x8xf32> to vector<8xf32>
    %65 = vector.shape_cast %64 : vector<8xf32> to vector<8x1xf32>
    %66 = tpu.reciprocal %65 : vector<8x1xf32> -> vector<8x1xf32>
    %67 = vector.broadcast %66 : vector<8x1xf32> to vector<8x8xf32>
    %68 = arith.mulf %63, %67 : vector<8x8xf32>
    %cst_32 = arith.constant dense<0.000000e+00> : vector<8x8xf32>
    %69 = tpu.matmul %68, %57, %cst_32 {dimension_numbers = #tpu.dot_dimension_numbers<[1], [0], [0], [1], [0, 0, 1, 1], [], []>} : vector<8x8xf32>, vector<8x8xf32>, vector<8x8xf32> -> vector<8x8xf32>
    %70 = vector.extract_strided_slice %17 {offsets = [16, 0], sizes = [8, 32], strides = [1, 1]} : vector<32x32xf32> to vector<8x32xf32>
    %cst_33 = arith.constant dense<0.000000e+00> : vector<8x32xf32>
    %71 = tpu.matmul %69, %70, %cst_33 {dimension_numbers = #tpu.dot_dimension_numbers<[1], [0], [0], [1], [0, 0, 1, 1], [], []>} : vector<8x8xf32>, vector<8x32xf32>, vector<8x32xf32> -> vector<8x32xf32>
    %72 = arith.addf %54, %71 : vector<8x32xf32>
    %73 = vector.extract_strided_slice %6 {offsets = [0, 24], sizes = [8, 8], strides = [1, 1]} : vector<16x32xf32> to vector<8x8xf32>
    %74 = vector.extract_strided_slice %11 {offsets = [0, 24], sizes = [8, 8], strides = [1, 1]} : vector<16x32xf32> to vector<8x8xf32>
    %75 = vector.extract_strided_slice %16 {offsets = [0, 24], sizes = [8, 8], strides = [1, 1]} : vector<16x32xf32> to vector<8x8xf32>
    %cst_34 = arith.constant dense<0.000000e+00> : vector<8x8xf32>
    %76 = tpu.matmul %73, %74, %cst_34 {dimension_numbers = #tpu.dot_dimension_numbers<[1], [1], [0], [0], [0, 0, 1, 0], [], []>} : vector<8x8xf32>, vector<8x8xf32>, vector<8x8xf32> -> vector<8x8xf32>
    %cst_35 = arith.constant dense<0xFF800000> : vector<8xf32>
    %77 = vector.multi_reduction <maximumf>, %76, %cst_35 [1] : vector<8x8xf32> to vector<8xf32>
    %78 = vector.shape_cast %77 : vector<8xf32> to vector<8x1xf32>
    %79 = vector.broadcast %78 : vector<8x1xf32> to vector<8x8xf32>
    %80 = arith.subf %76, %79 : vector<8x8xf32>
    %81 = math.exp %80 : vector<8x8xf32>
    %cst_36 = arith.constant dense<0.000000e+00> : vector<8xf32>
    %82 = vector.multi_reduction <add>, %81, %cst_36 [1] : vector<8x8xf32> to vector<8xf32>
    %83 = vector.shape_cast %82 : vector<8xf32> to vector<8x1xf32>
    %84 = tpu.reciprocal %83 : vector<8x1xf32> -> vector<8x1xf32>
    %85 = vector.broadcast %84 : vector<8x1xf32> to vector<8x8xf32>
    %86 = arith.mulf %81, %85 : vector<8x8xf32>
    %cst_37 = arith.constant dense<0.000000e+00> : vector<8x8xf32>
    %87 = tpu.matmul %86, %75, %cst_37 {dimension_numbers = #tpu.dot_dimension_numbers<[1], [0], [0], [1], [0, 0, 1, 1], [], []>} : vector<8x8xf32>, vector<8x8xf32>, vector<8x8xf32> -> vector<8x8xf32>
    %88 = vector.extract_strided_slice %17 {offsets = [24, 0], sizes = [8, 32], strides = [1, 1]} : vector<32x32xf32> to vector<8x32xf32>
    %cst_38 = arith.constant dense<0.000000e+00> : vector<8x32xf32>
    %89 = tpu.matmul %87, %88, %cst_38 {dimension_numbers = #tpu.dot_dimension_numbers<[1], [0], [0], [1], [0, 0, 1, 1], [], []>} : vector<8x8xf32>, vector<8x32xf32>, vector<8x32xf32> -> vector<8x32xf32>
    %90 = arith.addf %72, %89 : vector<8x32xf32>
    %cst_39 = arith.constant 0.000000e+00 : f32
    %91 = vector.broadcast %cst_39 : f32 to vector<8x32xf32>
    %92 = vector.extract_strided_slice %6 {offsets = [8, 0], sizes = [8, 8], strides = [1, 1]} : vector<16x32xf32> to vector<8x8xf32>
    %93 = vector.extract_strided_slice %11 {offsets = [8, 0], sizes = [8, 8], strides = [1, 1]} : vector<16x32xf32> to vector<8x8xf32>
    %94 = vector.extract_strided_slice %16 {offsets = [8, 0], sizes = [8, 8], strides = [1, 1]} : vector<16x32xf32> to vector<8x8xf32>
    %cst_40 = arith.constant dense<0.000000e+00> : vector<8x8xf32>
    %95 = tpu.matmul %92, %93, %cst_40 {dimension_numbers = #tpu.dot_dimension_numbers<[1], [1], [0], [0], [0, 0, 1, 0], [], []>} : vector<8x8xf32>, vector<8x8xf32>, vector<8x8xf32> -> vector<8x8xf32>
    %cst_41 = arith.constant dense<0xFF800000> : vector<8xf32>
    %96 = vector.multi_reduction <maximumf>, %95, %cst_41 [1] : vector<8x8xf32> to vector<8xf32>
    %97 = vector.shape_cast %96 : vector<8xf32> to vector<8x1xf32>
    %98 = vector.broadcast %97 : vector<8x1xf32> to vector<8x8xf32>
    %99 = arith.subf %95, %98 : vector<8x8xf32>
    %100 = math.exp %99 : vector<8x8xf32>
    %cst_42 = arith.constant dense<0.000000e+00> : vector<8xf32>
    %101 = vector.multi_reduction <add>, %100, %cst_42 [1] : vector<8x8xf32> to vector<8xf32>
    %102 = vector.shape_cast %101 : vector<8xf32> to vector<8x1xf32>
    %103 = tpu.reciprocal %102 : vector<8x1xf32> -> vector<8x1xf32>
    %104 = vector.broadcast %103 : vector<8x1xf32> to vector<8x8xf32>
    %105 = arith.mulf %100, %104 : vector<8x8xf32>
    %cst_43 = arith.constant dense<0.000000e+00> : vector<8x8xf32>
    %106 = tpu.matmul %105, %94, %cst_43 {dimension_numbers = #tpu.dot_dimension_numbers<[1], [0], [0], [1], [0, 0, 1, 1], [], []>} : vector<8x8xf32>, vector<8x8xf32>, vector<8x8xf32> -> vector<8x8xf32>
    %107 = vector.extract_strided_slice %17 {offsets = [0, 0], sizes = [8, 32], strides = [1, 1]} : vector<32x32xf32> to vector<8x32xf32>
    %cst_44 = arith.constant dense<0.000000e+00> : vector<8x32xf32>
    %108 = tpu.matmul %106, %107, %cst_44 {dimension_numbers = #tpu.dot_dimension_numbers<[1], [0], [0], [1], [0, 0, 1, 1], [], []>} : vector<8x8xf32>, vector<8x32xf32>, vector<8x32xf32> -> vector<8x32xf32>
    %109 = arith.addf %91, %108 : vector<8x32xf32>
    %110 = vector.extract_strided_slice %6 {offsets = [8, 8], sizes = [8, 8], strides = [1, 1]} : vector<16x32xf32> to vector<8x8xf32>
    %111 = vector.extract_strided_slice %11 {offsets = [8, 8], sizes = [8, 8], strides = [1, 1]} : vector<16x32xf32> to vector<8x8xf32>
    %112 = vector.extract_strided_slice %16 {offsets = [8, 8], sizes = [8, 8], strides = [1, 1]} : vector<16x32xf32> to vector<8x8xf32>
    %cst_45 = arith.constant dense<0.000000e+00> : vector<8x8xf32>
    %113 = tpu.matmul %110, %111, %cst_45 {dimension_numbers = #tpu.dot_dimension_numbers<[1], [1], [0], [0], [0, 0, 1, 0], [], []>} : vector<8x8xf32>, vector<8x8xf32>, vector<8x8xf32> -> vector<8x8xf32>
    %cst_46 = arith.constant dense<0xFF800000> : vector<8xf32>
    %114 = vector.multi_reduction <maximumf>, %113, %cst_46 [1] : vector<8x8xf32> to vector<8xf32>
    %115 = vector.shape_cast %114 : vector<8xf32> to vector<8x1xf32>
    %116 = vector.broadcast %115 : vector<8x1xf32> to vector<8x8xf32>
    %117 = arith.subf %113, %116 : vector<8x8xf32>
    %118 = math.exp %117 : vector<8x8xf32>
    %cst_47 = arith.constant dense<0.000000e+00> : vector<8xf32>
    %119 = vector.multi_reduction <add>, %118, %cst_47 [1] : vector<8x8xf32> to vector<8xf32>
    %120 = vector.shape_cast %119 : vector<8xf32> to vector<8x1xf32>
    %121 = tpu.reciprocal %120 : vector<8x1xf32> -> vector<8x1xf32>
    %122 = vector.broadcast %121 : vector<8x1xf32> to vector<8x8xf32>
    %123 = arith.mulf %118, %122 : vector<8x8xf32>
    %cst_48 = arith.constant dense<0.000000e+00> : vector<8x8xf32>
    %124 = tpu.matmul %123, %112, %cst_48 {dimension_numbers = #tpu.dot_dimension_numbers<[1], [0], [0], [1], [0, 0, 1, 1], [], []>} : vector<8x8xf32>, vector<8x8xf32>, vector<8x8xf32> -> vector<8x8xf32>
    %125 = vector.extract_strided_slice %17 {offsets = [8, 0], sizes = [8, 32], strides = [1, 1]} : vector<32x32xf32> to vector<8x32xf32>
    %cst_49 = arith.constant dense<0.000000e+00> : vector<8x32xf32>
    %126 = tpu.matmul %124, %125, %cst_49 {dimension_numbers = #tpu.dot_dimension_numbers<[1], [0], [0], [1], [0, 0, 1, 1], [], []>} : vector<8x8xf32>, vector<8x32xf32>, vector<8x32xf32> -> vector<8x32xf32>
    %127 = arith.addf %109, %126 : vector<8x32xf32>
    %128 = vector.extract_strided_slice %6 {offsets = [8, 16], sizes = [8, 8], strides = [1, 1]} : vector<16x32xf32> to vector<8x8xf32>
    %129 = vector.extract_strided_slice %11 {offsets = [8, 16], sizes = [8, 8], strides = [1, 1]} : vector<16x32xf32> to vector<8x8xf32>
    %130 = vector.extract_strided_slice %16 {offsets = [8, 16], sizes = [8, 8], strides = [1, 1]} : vector<16x32xf32> to vector<8x8xf32>
    %cst_50 = arith.constant dense<0.000000e+00> : vector<8x8xf32>
    %131 = tpu.matmul %128, %129, %cst_50 {dimension_numbers = #tpu.dot_dimension_numbers<[1], [1], [0], [0], [0, 0, 1, 0], [], []>} : vector<8x8xf32>, vector<8x8xf32>, vector<8x8xf32> -> vector<8x8xf32>
    %cst_51 = arith.constant dense<0xFF800000> : vector<8xf32>
    %132 = vector.multi_reduction <maximumf>, %131, %cst_51 [1] : vector<8x8xf32> to vector<8xf32>
    %133 = vector.shape_cast %132 : vector<8xf32> to vector<8x1xf32>
    %134 = vector.broadcast %133 : vector<8x1xf32> to vector<8x8xf32>
    %135 = arith.subf %131, %134 : vector<8x8xf32>
    %136 = math.exp %135 : vector<8x8xf32>
    %cst_52 = arith.constant dense<0.000000e+00> : vector<8xf32>
    %137 = vector.multi_reduction <add>, %136, %cst_52 [1] : vector<8x8xf32> to vector<8xf32>
    %138 = vector.shape_cast %137 : vector<8xf32> to vector<8x1xf32>
    %139 = tpu.reciprocal %138 : vector<8x1xf32> -> vector<8x1xf32>
    %140 = vector.broadcast %139 : vector<8x1xf32> to vector<8x8xf32>
    %141 = arith.mulf %136, %140 : vector<8x8xf32>
    %cst_53 = arith.constant dense<0.000000e+00> : vector<8x8xf32>
    %142 = tpu.matmul %141, %130, %cst_53 {dimension_numbers = #tpu.dot_dimension_numbers<[1], [0], [0], [1], [0, 0, 1, 1], [], []>} : vector<8x8xf32>, vector<8x8xf32>, vector<8x8xf32> -> vector<8x8xf32>
    %143 = vector.extract_strided_slice %17 {offsets = [16, 0], sizes = [8, 32], strides = [1, 1]} : vector<32x32xf32> to vector<8x32xf32>
    %cst_54 = arith.constant dense<0.000000e+00> : vector<8x32xf32>
    %144 = tpu.matmul %142, %143, %cst_54 {dimension_numbers = #tpu.dot_dimension_numbers<[1], [0], [0], [1], [0, 0, 1, 1], [], []>} : vector<8x8xf32>, vector<8x32xf32>, vector<8x32xf32> -> vector<8x32xf32>
    %145 = arith.addf %127, %144 : vector<8x32xf32>
    %146 = vector.extract_strided_slice %6 {offsets = [8, 24], sizes = [8, 8], strides = [1, 1]} : vector<16x32xf32> to vector<8x8xf32>
    %147 = vector.extract_strided_slice %11 {offsets = [8, 24], sizes = [8, 8], strides = [1, 1]} : vector<16x32xf32> to vector<8x8xf32>
    %148 = vector.extract_strided_slice %16 {offsets = [8, 24], sizes = [8, 8], strides = [1, 1]} : vector<16x32xf32> to vector<8x8xf32>
    %cst_55 = arith.constant dense<0.000000e+00> : vector<8x8xf32>
    %149 = tpu.matmul %146, %147, %cst_55 {dimension_numbers = #tpu.dot_dimension_numbers<[1], [1], [0], [0], [0, 0, 1, 0], [], []>} : vector<8x8xf32>, vector<8x8xf32>, vector<8x8xf32> -> vector<8x8xf32>
    %cst_56 = arith.constant dense<0xFF800000> : vector<8xf32>
    %150 = vector.multi_reduction <maximumf>, %149, %cst_56 [1] : vector<8x8xf32> to vector<8xf32>
    %151 = vector.shape_cast %150 : vector<8xf32> to vector<8x1xf32>
    %152 = vector.broadcast %151 : vector<8x1xf32> to vector<8x8xf32>
    %153 = arith.subf %149, %152 : vector<8x8xf32>
    %154 = math.exp %153 : vector<8x8xf32>
    %cst_57 = arith.constant dense<0.000000e+00> : vector<8xf32>
    %155 = vector.multi_reduction <add>, %154, %cst_57 [1] : vector<8x8xf32> to vector<8xf32>
    %156 = vector.shape_cast %155 : vector<8xf32> to vector<8x1xf32>
    %157 = tpu.reciprocal %156 : vector<8x1xf32> -> vector<8x1xf32>
    %158 = vector.broadcast %157 : vector<8x1xf32> to vector<8x8xf32>
    %159 = arith.mulf %154, %158 : vector<8x8xf32>
    %cst_58 = arith.constant dense<0.000000e+00> : vector<8x8xf32>
    %160 = tpu.matmul %159, %148, %cst_58 {dimension_numbers = #tpu.dot_dimension_numbers<[1], [0], [0], [1], [0, 0, 1, 1], [], []>} : vector<8x8xf32>, vector<8x8xf32>, vector<8x8xf32> -> vector<8x8xf32>
    %161 = vector.extract_strided_slice %17 {offsets = [24, 0], sizes = [8, 32], strides = [1, 1]} : vector<32x32xf32> to vector<8x32xf32>
    %cst_59 = arith.constant dense<0.000000e+00> : vector<8x32xf32>
    %162 = tpu.matmul %160, %161, %cst_59 {dimension_numbers = #tpu.dot_dimension_numbers<[1], [0], [0], [1], [0, 0, 1, 1], [], []>} : vector<8x8xf32>, vector<8x32xf32>, vector<8x32xf32> -> vector<8x32xf32>
    %163 = arith.addf %145, %162 : vector<8x32xf32>
    %164 = tpu.concatenate %90, %163 in 0 : vector<8x32xf32>, vector<8x32xf32> -> vector<16x32xf32>
    %165 = arith.addf %1, %164 : vector<16x32xf32>
    %c0_60 = arith.constant 0 : index
    %c0_61 = arith.constant 0 : index
    %166 = vector.load %arg9[%c0_60, %c0_61] : memref<1x32xf32, #tpu.memory_space<vmem>>, vector<1x32xf32>
    %167 = vector.broadcast %166 : vector<1x32xf32> to vector<16x32xf32>
    %168 = arith.addf %165, %167 : vector<16x32xf32>
    %c0_62 = arith.constant 0 : index
    %c0_63 = arith.constant 0 : index
    %169 = vector.load %arg10[%c0_62, %c0_63] : memref<32x16xf32, #tpu.memory_space<vmem>>, vector<32x16xf32>
    %cst_64 = arith.constant dense<0.000000e+00> : vector<16x16xf32>
    %170 = tpu.matmul %168, %169, %cst_64 {dimension_numbers = #tpu.dot_dimension_numbers<[1], [0], [0], [1], [0, 0, 1, 1], [], []>} : vector<16x32xf32>, vector<32x16xf32>, vector<16x16xf32> -> vector<16x16xf32>
    %c0_65 = arith.constant 0 : index
    %c0_66 = arith.constant 0 : index
    %171 = vector.load %arg11[%c0_65, %c0_66] : memref<1x16xf32, #tpu.memory_space<vmem>>, vector<1x16xf32>
    %172 = vector.broadcast %171 : vector<1x16xf32> to vector<16x16xf32>
    %173 = arith.addf %170, %172 : vector<16x16xf32>
    %c0_67 = arith.constant 0 : index
    %c0_68 = arith.constant 0 : index
    %174 = vector.load %arg12[%c0_67, %c0_68] : memref<16x32xf32, #tpu.memory_space<vmem>>, vector<16x32xf32>
    %cst_69 = arith.constant dense<0.000000e+00> : vector<16x32xf32>
    %175 = tpu.matmul %173, %174, %cst_69 {dimension_numbers = #tpu.dot_dimension_numbers<[1], [0], [0], [1], [0, 0, 1, 1], [], []>} : vector<16x16xf32>, vector<16x32xf32>, vector<16x32xf32> -> vector<16x32xf32>
    %c0_70 = arith.constant 0 : index
    %c0_71 = arith.constant 0 : index
    %176 = vector.load %arg13[%c0_70, %c0_71] : memref<1x32xf32, #tpu.memory_space<vmem>>, vector<1x32xf32>
    %177 = vector.broadcast %176 : vector<1x32xf32> to vector<16x32xf32>
    %178 = arith.addf %175, %177 : vector<16x32xf32>
    %179 = arith.addf %168, %178 : vector<16x32xf32>
    %180 = vector.shape_cast %179 : vector<16x32xf32> to vector<2x8x32xf32>
    %c0_72 = arith.constant 0 : index
    %c0_73 = arith.constant 0 : index
    %c0_74 = arith.constant 0 : index
    %181 = vector.load %arg14[%c0_72, %c0_73, %c0_74] : memref<2x8x32xf32, #tpu.memory_space<vmem>>, vector<2x8x32xf32>
    tpu.vector_store %arg14[%c0_72, %c0_73, %c0_74], %180 {strides = array<i32>} : memref<2x8x32xf32, #tpu.memory_space<vmem>>, vector<2x8x32xf32>,
    return
  }
  func.func @transform_0(%arg0: i32) -> (i32, i32, i32) {
    %c0_i32 = arith.constant 0 : i32
    %c0_i32_0 = arith.constant 0 : i32
    %c0_i32_1 = arith.constant 0 : i32
    return %arg0, %c0_i32, %c0_i32_0 : i32, i32, i32
  }
  func.func @transform_1(%arg0: i32) -> (i32, i32) {
    %c0_i32 = arith.constant 0 : i32
    %c0_i32_0 = arith.constant 0 : i32
    %c0_i32_1 = arith.constant 0 : i32
    return %c0_i32, %c0_i32_0 : i32, i32
  }
  func.func @transform_2(%arg0: i32) -> (i32, i32) {
    %c0_i32 = arith.constant 0 : i32
    %c0_i32_0 = arith.constant 0 : i32
    %c0_i32_1 = arith.constant 0 : i32
    return %c0_i32, %c0_i32_0 : i32, i32
  }
  func.func @transform_3(%arg0: i32) -> (i32, i32) {
    %c0_i32 = arith.constant 0 : i32
    %c0_i32_0 = arith.constant 0 : i32
    %c0_i32_1 = arith.constant 0 : i32
    return %c0_i32, %c0_i32_0 : i32, i32
  }
  func.func @transform_4(%arg0: i32) -> (i32, i32) {
    %c0_i32 = arith.constant 0 : i32
    %c0_i32_0 = arith.constant 0 : i32
    %c0_i32_1 = arith.constant 0 : i32
    return %c0_i32, %c0_i32_0 : i32, i32
  }
  func.func @transform_5(%arg0: i32) -> (i32, i32) {
    %c0_i32 = arith.constant 0 : i32
    %c0_i32_0 = arith.constant 0 : i32
    %c0_i32_1 = arith.constant 0 : i32
    return %c0_i32, %c0_i32_0 : i32, i32
  }
  func.func @transform_6(%arg0: i32) -> (i32, i32) {
    %c0_i32 = arith.constant 0 : i32
    %c0_i32_0 = arith.constant 0 : i32
    %c0_i32_1 = arith.constant 0 : i32
    return %c0_i32, %c0_i32_0 : i32, i32
  }
  func.func @transform_7(%arg0: i32) -> (i32, i32) {
    %c0_i32 = arith.constant 0 : i32
    %c0_i32_0 = arith.constant 0 : i32
    %c0_i32_1 = arith.constant 0 : i32
    return %c0_i32, %c0_i32_0 : i32, i32
  }
  func.func @transform_8(%arg0: i32) -> (i32, i32) {
    %c0_i32 = arith.constant 0 : i32
    %c0_i32_0 = arith.constant 0 : i32
    %c0_i32_1 = arith.constant 0 : i32
    return %c0_i32, %c0_i32_0 : i32, i32
  }
  func.func @transform_9(%arg0: i32) -> (i32, i32) {
    %c0_i32 = arith.constant 0 : i32
    %c0_i32_0 = arith.constant 0 : i32
    %c0_i32_1 = arith.constant 0 : i32
    return %c0_i32, %c0_i32_0 : i32, i32
  }
  func.func @transform_10(%arg0: i32) -> (i32, i32) {
    %c0_i32 = arith.constant 0 : i32
    %c0_i32_0 = arith.constant 0 : i32
    %c0_i32_1 = arith.constant 0 : i32
    return %c0_i32, %c0_i32_0 : i32, i32
  }
  func.func @transform_11(%arg0: i32) -> (i32, i32) {
    %c0_i32 = arith.constant 0 : i32
    %c0_i32_0 = arith.constant 0 : i32
    %c0_i32_1 = arith.constant 0 : i32
    return %c0_i32, %c0_i32_0 : i32, i32
  }
  func.func @transform_12(%arg0: i32) -> (i32, i32) {
    %c0_i32 = arith.constant 0 : i32
    %c0_i32_0 = arith.constant 0 : i32
    %c0_i32_1 = arith.constant 0 : i32
    return %c0_i32, %c0_i32_0 : i32, i32
  }
  func.func @transform_13(%arg0: i32) -> (i32, i32, i32) {
    %c0_i32 = arith.constant 0 : i32
    %c0_i32_0 = arith.constant 0 : i32
    %c0_i32_1 = arith.constant 0 : i32
    return %arg0, %c0_i32, %c0_i32_0 : i32, i32, i32
  }
}

</mosaic_0001>

<bundles_post_ra>
// kernel: tpu_custom_call.1
= control target key start
LH: loop header
LB: loop body
LE: loop exit
PB: predicated region body
PF: predicated region fallthrough
CT: control target
= control target key end

     0   :  { %18 = vsyncpa [#allocation3], 0  ;;  %s3451_s0 = inlined_call_operand.vmem [shape: f32[2,8,32], index: 0, kind: input, shape index: {}]   ;;  %s3452_s1 = inlined_call_operand.vmem [shape: f32[32,32], index: 1, kind: input, shape index: {}]   ;;  %s3453_s2 = inlined_call_operand.hbm [shape: f32[1,32], index: 2, kind: input, shape index: {}]   ;;  %s3454_s3 = inlined_call_operand.hbm [shape: f32[32,32], index: 3, kind: input, shape index: {}]   ;;  %s3455_s4 = inlined_call_operand.hbm [shape: f32[1,32], index: 4, kind: input, shape index: {}]   ;;  %s3456_s5 = inlined_call_operand.hbm [shape: f32[32,32], index: 5, kind: input, shape index: {}]   ;;  %s3457_s6 = inlined_call_operand.hbm [shape: f32[1,32], index: 6, kind: input, shape index: {}]   ;;  %s3458_s7 = inlined_call_operand.hbm [shape: f32[32,32], index: 7, kind: input, shape index: {}]   ;;  %s3459_s8 = inlined_call_operand.hbm [shape: f32[1,32], index: 8, kind: input, shape index: {}]   ;;  %s3460_s9 = inlined_call_operand.vmem [shape: f32[32,16], index: 9, kind: input, shape index: {}]   ;;  %s3461_s10 = inlined_call_operand.vmem [shape: f32[1,16], index: 10, kind: input, shape index: {}]   ;;  %s3462_s11 = inlined_call_operand.hbm [shape: f32[16,32], index: 11, kind: input, shape index: {}]   ;;  %s3463_s12 = inlined_call_operand.vmem [shape: f32[1,32], index: 12, kind: input, shape index: {}]   ;;  %s3464_s13 = inlined_call_operand.hbm [shape: f32[2,8,32], index: 13, kind: output, shape index: {}]  }
   0x1   :  { %19 = vsyncpa [#allocation6], 0 }
   0x2   :  { %20 = vsyncpa [#allocation9], 0 }
   0x3   :  { %21 = vsyncpa [#allocation12], 0 }
   0x4   :  { %22 = vsyncpa [#allocation15], 0 }
   0x5   :  { %23 = vsyncpa [#allocation4], 0  ;;  %s3072_s25 = smov [#allocation5]  }
   0x6   :  { %s43_s26 = sshll.u32 %s3072_s25, 4  ;;  %s44_s26 = int_to_ptr.vmem [resolvable:$true] %s43_s26 }
   0x7   :  { %s2888_s27 = scalar_lea.vmem %s44_s26, 512  ;;  %p2893_p1 = scmp.lt.s32.totalorder %s44_s26, %s44_s26 }
   0x8   :  { %p2889_p0 = scmp.ne.s32.totalorder %s44_s26, %s2888_s27  ;;  %p2894_p2 = scmp.lt.s32.totalorder %s2888_s27, %s2888_s27 }
   0xa   :  { %p2895_p3 = por %p2894_p2, %p2893_p1 }
   0xc   :  { %p2896_p4 = pnand %p2895_p3, %p2889_p0 }
   0xe   :  { %2899 = shalt.err (!%p2896_p4)
}
   0xf   :  { %s3073_s28 = smov 128   ;;  %s3074_s29 = smov 8  }
  0x10   :  { %49 = dma.hbm_to_vmem [thread:$0]  %s3454_s3, 512, %s44_s26, [#allocation6], %s3073_s28, %s3073_s28, %s3074_s29  }
  0x11   :  { %s3075_s15 = smov [#allocation8]   ;;  %s3076_s17 = smov [#allocation11]  }
  0x12   :  { %s65_s16 = sshll.u32 %s3075_s15, 4  ;;  %s87_s18 = sshll.u32 %s3076_s17, 4  ;;  %s66_s16 = int_to_ptr.vmem [resolvable:$true] %s65_s16  ;;  %s88_s18 = int_to_ptr.vmem [resolvable:$true] %s87_s18 }
  0x13   :  { %s2908_s19 = scalar_lea.vmem %s66_s16, 512  ;;  %p2913_p6 = scmp.lt.s32.totalorder %s66_s16, %s66_s16 }
  0x14   :  { %p2909_p5 = scmp.ne.s32.totalorder %s66_s16, %s2908_s19  ;;  %p2914_p7 = scmp.lt.s32.totalorder %s2908_s19, %s2908_s19 }
  0x16   :  { %p2915_p8 = por %p2914_p7, %p2913_p6 }
  0x18   :  { %p2916_p9 = pnand %p2915_p8, %p2909_p5 }
  0x1a   :  { %2919 = shalt.err (!%p2916_p9)
}
  0x1b   :  { %71 = dma.hbm_to_vmem [thread:$0]  %s3456_s5, 512, %s66_s16, [#allocation9], %s3073_s28, %s3073_s28, %s3074_s29  }
  0x1c   :  { %s2928_s3 = scalar_lea.vmem %s88_s18, 512  ;;  %p2933_p11 = scmp.lt.s32.totalorder %s88_s18, %s88_s18 }
  0x1d   :  { %p2929_p10 = scmp.ne.s32.totalorder %s88_s18, %s2928_s3  ;;  %p2934_p12 = scmp.lt.s32.totalorder %s2928_s3, %s2928_s3 }
  0x1f   :  { %p2935_p13 = por %p2934_p12, %p2933_p11 }
  0x21   :  { %p2936_p0 = pnand %p2935_p13, %p2929_p10 }
  0x23   :  { %2939 = shalt.err (!%p2936_p0)
}
  0x24   :  { %93 = dma.hbm_to_vmem [thread:$0]  %s3458_s7, 512, %s88_s18, [#allocation12], %s3073_s28, %s3073_s28, %s3074_s29  }
  0x25   :  { %s3077_s24 = smov [#allocation2]   ;;  %s3078_s26 = smov [#allocation7]  }
  0x26   :  { %s34_s25 = sshll.u32 %s3077_s24, 4  ;;  %s56_s5 = sshll.u32 %s3078_s26, 4  ;;  %s35_s25 = int_to_ptr.vmem [resolvable:$true] %s34_s25  ;;  %s57_s5 = int_to_ptr.vmem [resolvable:$true] %s56_s5 }
  0x27   :  { %s2948_s27 = scalar_lea.vmem %s35_s25, 16  ;;  %s2952_s30 = scalar_lea.vmem %s35_s25, 32 }
  0x28   :  { %p2949_p1 = scmp.ne.s32.totalorder %s35_s25, %s2948_s27  ;;  %p2953_p2 = scmp.lt.s32.totalorder %s35_s25, %s35_s25 }
  0x29   :  { %p2954_p3 = scmp.lt.s32.totalorder %s2952_s30, %s2948_s27 }
  0x2b   :  { %p2955_p4 = por %p2954_p3, %p2953_p2 }
  0x2d   :  { %p2956_p5 = pnand %p2955_p4, %p2949_p1 }
  0x2f   :  { %2959 = shalt.err (!%p2956_p5)
}
  0x30   :  { %37 = dma.hbm_to_vmem [thread:$0]  %s3453_s2, 16, %s35_s25, [#allocation3]  }
  0x31   :  { %s2968_s16 = scalar_lea.vmem %s57_s5, 16  ;;  %s2972_s7 = scalar_lea.vmem %s57_s5, 32 }
  0x32   :  { %p2969_p6 = scmp.ne.s32.totalorder %s57_s5, %s2968_s16  ;;  %p2973_p7 = scmp.lt.s32.totalorder %s57_s5, %s57_s5 }
  0x33   :  { %p2974_p8 = scmp.lt.s32.totalorder %s2972_s7, %s2968_s16 }
  0x35   :  { %p2975_p9 = por %p2974_p8, %p2973_p7 }
  0x37   :  { %p2976_p10 = pnand %p2975_p9, %p2969_p6 }
  0x39   :  { %2979 = shalt.err (!%p2976_p10)
}
  0x3a   :  { %59 = dma.hbm_to_vmem [thread:$0]  %s3455_s4, 16, %s57_s5, [#allocation6]  }
  0x3b   :  { %s3079_s19 = smov [#allocation10]   ;;  %s3080_s21 = smov [#allocation13]  }
  0x3c   :  { %s78_s20 = sshll.u32 %s3079_s19, 4  ;;  %s100_s3 = sshll.u32 %s3080_s21, 4  ;;  %s79_s20 = int_to_ptr.vmem [resolvable:$true] %s78_s20  ;;  %s101_s3 = int_to_ptr.vmem [resolvable:$true] %s100_s3 }
  0x3d   :  { %s2988_s22 = scalar_lea.vmem %s79_s20, 16  ;;  %s2992_s2 = scalar_lea.vmem %s79_s20, 32 }
  0x3e   :  { %p2989_p11 = scmp.ne.s32.totalorder %s79_s20, %s2988_s22  ;;  %p2993_p12 = scmp.lt.s32.totalorder %s79_s20, %s79_s20 }
  0x3f   :  { %p2994_p13 = scmp.lt.s32.totalorder %s2992_s2, %s2988_s22 }
  0x41   :  { %p2995_p0 = por %p2994_p13, %p2993_p12 }
  0x43   :  { %p2996_p1 = pnand %p2995_p0, %p2989_p11 }
  0x45   :  { %2999 = shalt.err (!%p2996_p1)
}
  0x46   :  { %81 = dma.hbm_to_vmem [thread:$0]  %s3457_s6, 16, %s79_s20, [#allocation9]  }
  0x47   :  { %s3008_s25 = scalar_lea.vmem %s101_s3, 16  ;;  %s3012_s4 = scalar_lea.vmem %s101_s3, 32 }
  0x48   :  { %p3009_p2 = scmp.ne.s32.totalorder %s101_s3, %s3008_s25  ;;  %p3013_p3 = scmp.lt.s32.totalorder %s101_s3, %s101_s3 }
  0x49   :  { %p3014_p4 = scmp.lt.s32.totalorder %s3012_s4, %s3008_s25 }
  0x4b   :  { %p3015_p5 = por %p3014_p4, %p3013_p3 }
  0x4d   :  { %p3016_p6 = pnand %p3015_p5, %p3009_p2 }
  0x4f   :  { %3019 = shalt.err (!%p3016_p6)
}
  0x50   :  { %103 = dma.hbm_to_vmem [thread:$0]  %s3459_s8, 16, %s101_s3, [#allocation12]  }
  0x51   :  { %s3081_s27 = smov [#allocation14]  }
  0x52   :  { %s113_s30 = sshll.u32 %s3081_s27, 4  ;;  %s114_s30 = int_to_ptr.vmem [resolvable:$true] %s113_s30 }
  0x53   :  { %s3028_s14 = scalar_lea.vmem %s114_s30, 256  ;;  %p3033_p8 = scmp.lt.s32.totalorder %s114_s30, %s114_s30 }
  0x54   :  { %p3029_p7 = scmp.ne.s32.totalorder %s114_s30, %s3028_s14  ;;  %p3034_p9 = scmp.lt.s32.totalorder %s3028_s14, %s3028_s14 }
  0x56   :  { %p3035_p10 = por %p3034_p9, %p3033_p8 }
  0x58   :  { %p3036_p11 = pnand %p3035_p10, %p3029_p7 }
  0x5a   :  { %3039 = shalt.err (!%p3036_p11)
}
  0x5b   :  { %119 = dma.hbm_to_vmem [thread:$0]  %s3462_s11, 256, %s114_s30, [#allocation15], %s3073_s28, %s3073_s28, %s3074_s29  }
  0x5c   :  { %3060 = dma.done.wait [#allocation3], 16  }
  0x5d   :  { %3061 = vsyncadd [#allocation3], 4294967280 }
  0x5e   :  { %3062 = dma.done.wait [#allocation6], 528  }
  0x5f   :  { %3063 = vsyncadd [#allocation6], 4294966768 }
  0x60   :  { %3064 = dma.done.wait [#allocation9], 528  }
  0x61   :  { %3065 = vsyncadd [#allocation9], 4294966768 }
  0x62   :  { %3066 = dma.done.wait [#allocation12], 528  }
  0x63   :  { %3067 = vsyncadd [#allocation12], 4294966768 }
  0x64   :  { %3068 = dma.done.wait [#allocation15], 256  }
  0x65   :  { %3069 = vsyncadd [#allocation15], 4294967040  ;;  %v244_v0 = vld [vmem:[#allocation5 + $0x18] sm:$0xff]  ;;  %v243_v2 = vld [vmem:[#allocation5 + $0x10] sm:$0xff]  ;;  %vm159_vm0 = vcmask 261120   ;;  %v3082_v10 = vmov 0.0  }
  0x66   :  { %v151_v1 = vld [vmem:[%s3452_s1 + $0x18] sm:$0xff]  ;;  %2672 = vmatprep.subr.mxu1 %v244_v0  ;;  %v150_v3 = vld [vmem:[%s3452_s1 + $0x10] sm:$0xff]  ;;  %v149_v5 = vld [vmem:[%s3452_s1 + $0x8] sm:$0xff]  ;;  %vm3083_vm1 = vmmov 0   ;;  %vm417_vm2 = vcmask 64512   ;;  %s3086_s23 = smov 104  }
  0x67   :  { %2661 = vmatprep.subr.mxu0 %v151_v1  ;;  %2673 = vmatpush3.msra.mxu1 %v244_v0  ;;  %v242_v4 = vld [vmem:[#allocation5 + $0x8] sm:$0xff]  ;;  %v241_v6 = vld [vmem:[#allocation5] sm:$0xff]  ;;  %v329_v12 = vld [vmem:[#allocation8 + $0x10] sm:$0xff]  ;;  %vm2430_vm3 = vcmask 130048   ;;  %s3087_s16 = smov [#allocation16]  }
  0x68   :  { %2662 = vmatpush3.msra.mxu0 %v151_v1  ;;  %2674 = vmatprep.subr.mxu1 %v243_v2  ;;  %v3206_v7 = vld [vmem:[%s3451_s0] sm:$0xff]  ;;  %v3214_v9 = vld [vmem:[%s3451_s0 + $0x8] sm:$0xff]  ;;  %s3084_s0 = smov 120   ;;  %s2521_s7 = sshll.u32 %s3087_s16, 4  ;;  %s2522_s7 = int_to_ptr.vmem [resolvable:$true] %s2521_s7 }
  0x69   :  { %2663 = vmatprep.subr.mxu0 %v150_v3  ;;  %2675 = vmatpush3.msra.mxu1 %v243_v2  ;;  %v148_v8 = vld [vmem:[%s3452_s1] sm:$0xff]  ;;  %v328_v13 = vld [vmem:[#allocation8 + $0x8] sm:$0xff]  ;;  %s3085_s1 = smov 112   ;;  %p3045_p13 = scmp.lt.s32.totalorder %s2522_s7, %s2522_s7 }
  0x6a   :  { %2664 = vmatpush3.msra.mxu0 %v150_v3  ;;  %2676 = vmatprep.subr.mxu1 %v242_v4  ;;  %v330_v11 = vld [vmem:[#allocation8 + $0x18] sm:$0xff]  ;;  %v327_v14 = vld [vmem:[#allocation8] sm:$0xff]  ;;  %v3279_v51 = vld [vmem:[#allocation11 + $0x8] sm:$0xff] }
  0x6b   :  { %2665 = vmatprep.subr.mxu0 %v149_v5  ;;  %2677 = vmatpush3.msra.mxu1 %v242_v4  ;;  %v2540_v15 = vld [vmem:[#allocation7] ss:$0 sm:$0xff]  ;;  %v2537_v17 = vld [vmem:[#allocation2] ss:$0 sm:$0xff]  ;;  %v2543_v25 = vld [vmem:[#allocation10] ss:$0 sm:$0xff] }
  0x6c   :  { %2666 = vmatpush3.msra.mxu0 %v149_v5  ;;  %2678 = vmatprep.subr.mxu1 %v241_v6  ;;  %v3284_v56 = vld [vmem:[#allocation11] sm:$0xff] }
  0x6d   :  { %2680 = vmatprep.mubr.msk.f32.mxu1 %vm159_vm0, %v3206_v7  ;;  %2679 = vmatpush3.msra.mxu1 %v241_v6 }
  0x6e   :  { %2667 = vmatprep.subr.mxu0 %v148_v8  ;;  %2681 = vmatmul.mubr.msk.f32.vlgmr.msra.gmra.mxu1 %vm159_vm0, %v3214_v9 }
  0x6f   :  { %2668 = vmatpush3.msra.mxu0 %v148_v8  ;;  %2669 = vmatprep.mubr.msk.f32.mxu0 %vm159_vm0, %v3206_v7 }
  0x70   :  { %2670 = vmatmul.mubr.msk.f32.vlgmr.msra.gmra.mxu0 %vm159_vm0, %v3214_v9  ;;  %2694 = vmatprep.subr.mxu1 %v3082_v10 }
  0x71   :  { %2691 = vmatprep.mubr.msk.f32.mxu0 %vm159_vm0, %v3206_v7  ;;  %2696 = vmatprep.mubr.msk.f32.mxu1 %vm3083_vm1, %v3082_v10 }
  0x72   :  { %2683 = vmatprep.subr.mxu0 %v330_v11 }
  0x73   :  { %2684 = vmatpush3.msra.mxu0 %v330_v11 }
  0x74   :  { %2685 = vmatprep.subr.mxu0 %v329_v12 }
  0x75   :  { %2686 = vmatpush3.msra.mxu0 %v329_v12 }
  0x76   :  { %2687 = vmatprep.subr.mxu0 %v328_v13 }
  0x77   :  { %2688 = vmatpush3.msra.mxu0 %v328_v13 }
  0x78   :  { %2689 = vmatprep.subr.mxu0 %v327_v14 }
  0x79   :  { %2690 = vmatpush3.msra.mxu0 %v327_v14 }
  0x7a   :  { %2692 = vmatmul.mubr.msk.f32.vlgmr.msra.gmra.mxu0 %vm159_vm0, %v3214_v9  ;;  %2704 = vmatprep.subr.mxu0 %v3082_v10 }
  0x7b   :  { %2706 = vmatprep.mubr.msk.f32.mxu0 %vm3083_vm1, %v3082_v10 }
 0x12e   :  { %v2682_v16 = vpop.f32.mrf.mxu1 }
 0x12f   :  { %v3234_v18 = vadd.f32 %v2682_v16, %v2540_v15 }
 0x130   :  { %v2671_v19 = vpop.f32.mrf.mxu0  ;;  %v318_v20 = vpop.f32.mrf.mxu1 }
 0x131   :  { %v3236_v21 = vadd.f32 %v2671_v19, %v2537_v17  ;;  %v3238_v22 = vadd.f32 %v2540_v15, %v318_v20  ;;  %v3313_v15 = vld [vmem:[#allocation11 + $0x10] sm:$0xff] }
 0x132   :  { %v232_v23 = vpop.f32.mrf.mxu0 }
 0x133   :  { %v3240_v24 = vadd.f32 %v2537_v17, %v232_v23  ;;  %580 = vrot.lane.b32.xlu0 %v3238_v22, %s3084_s0  ;;  %2695 = vmatpush3.xpose.msk.msra.mxu1 %vm417_vm2, %v3238_v22 }
 0x134   :  { %2699 = vmatprep.subr.mxu1 %v3082_v10 }
 0x136   :  { %2697 = vmatmul.mubr.msk.f32.vlgmr.msra.gmra.mxu1 %vm417_vm2, %v3240_v24 }
 0x137   :  { %578 = vrot.lane.b32.xlu0 %v3240_v24, %s3084_s0  ;;  %2701 = vmatprep.mubr.msk.f32.mxu1 %vm3083_vm1, %v3082_v10 }
 0x13a   :  { %v2693_v26 = vpop.f32.mrf.mxu0 }
 0x13b   :  { %v3253_v27 = vadd.f32 %v2693_v26, %v2543_v25 }
 0x13c   :  { %v404_v28 = vpop.f32.mrf.mxu0 }
 0x13d   :  { %v3255_v29 = vadd.f32 %v2543_v25, %v404_v28 }
 0x13f   :  { %2700 = vmatpush3.msra.mxu1 %v3255_v29 }
 0x140   :  { %2709 = vmatprep.subr.mxu1 %v3082_v10 }
 0x1a5   :  { %v581_v30 = vpop.permute.xlu0 %580 }
 0x1a6   :  { %2705 = vmatpush3.xpose.msk.msra.mxu0 %vm417_vm2, %v581_v30 }
 0x1a7   :  { %2714 = vmatprep.subr.mxu0 %v3082_v10 }
 0x1a9   :  { %v579_v31 = vpop.permute.xlu0 %578 }
 0x1aa   :  { %2707 = vmatmul.mubr.msk.f32.vlgmr.msra.gmra.mxu0 %vm417_vm2, %v579_v31 }
 0x1ab   :  { %2716 = vmatprep.mubr.msk.f32.mxu0 %vm3083_vm1, %v3082_v10  ;;  %2715 = vmatpush3.msra.mxu0 %v3279_v51 }
 0x1ac   :  { %2724 = vmatprep.subr.mxu0 %v3082_v10 }
 0x1f6   :  { %v490_v32 = vpop.f32.mrf.mxu1 }
 0x1f7   :  { %v494_v33 = vsel %vm417_vm2, %v490_v32, -inf }
 0x1f8   :  { %495 = vmax.xlane.f32.xlu1 %v494_v33  ;;  %v2698_v34 = vpop.f32.mrf.mxu1 }
 0x26a   :  { %v652_v35 = vpop.f32.mrf.mxu0 }
 0x26b   :  { %v656_v36 = vsel %vm417_vm2, %v652_v35, -inf }
 0x26c   :  { %v2708_v37 = vpop.f32.mrf.mxu0  ;;  %657 = vmax.xlane.f32.xlu1 %v656_v36 }
 0x281   :  { %v496_v38 = vpop.xlane.xlu1 %495 }
 0x282   :  { %v497_v39 = vsub.f32 %v490_v32, %v496_v38 }
 0x284   :  { %v498_v40 = vmul.f32 1.442695, %v497_v39  ;;  %v3333_v39 = vld [vmem:[#allocation11 + $0x18] sm:$0xff] }
 0x286   :  { %2848 = vpow2.f32 %v498_v40 }
 0x293   :  { %v2849_v41 = vpop.eup %2848 }
 0x294   :  { %v500_v42 = vsel %vm417_vm2, %v2849_v41, 0.0 }
 0x295   :  { %501 = vadd.xlane.f32.xlu0 %v500_v42 }
 0x2ab   :  { %979 = vrot.lane.b32.xlu0 %v3255_v29, %s3085_s1 }
 0x2f5   :  { %v658_v43 = vpop.xlane.xlu1 %657 }
 0x2f6   :  { %v659_v44 = vsub.f32 %v652_v35, %v658_v43 }
 0x2f8   :  { %v660_v45 = vmul.f32 1.442695, %v659_v44 }
 0x2fa   :  { %2850 = vpow2.f32 %v660_v45 }
 0x307   :  { %v2851_v46 = vpop.eup %2850 }
 0x308   :  { %v662_v47 = vsel %vm417_vm2, %v2851_v46, 0.0 }
 0x309   :  { %663 = vadd.xlane.f32.xlu1 %v662_v47 }
 0x31a   :  { %668 = vrot.lane.b32.xlu1 %v3255_v29, %s3084_s0 }
 0x31e   :  { %v502_v48 = vpop.xlane.xlu0 %501  ;;  %892 = vrot.lane.b32.xlu1 %v3238_v22, %s3085_s1 }
 0x31f   :  { %2852 = vrcp.f32 %v502_v48 }
 0x322   :  { %890 = vrot.lane.b32.xlu1 %v3240_v24, %s3085_s1  ;;  %v980_v58 = vpop.permute.xlu0 %979 }
 0x32c   :  { %v2853_v49 = vpop.eup %2852 }
 0x32d   :  { %v504_v50 = vmul.f32 %v2853_v49, %v2849_v41 }
 0x32f   :  { %2702 = vmatmul.mubr.msk.f32.vlgmr.msra.gmra.mxu1 %vm417_vm2, %v504_v50 }
 0x330   :  { %2711 = vmatprep.mubr.msk.f32.mxu1 %vm3083_vm1, %v3082_v10 }
 0x392   :  { %v664_v52 = vpop.xlane.xlu1 %663 }
 0x393   :  { %2854 = vrcp.f32 %v664_v52 }
 0x396   :  { %v669_v53 = vpop.permute.xlu1 %668 }
 0x397   :  { %2710 = vmatpush3.msra.mxu1 %v669_v53 }
 0x398   :  { %2719 = vmatprep.subr.mxu1 %v3082_v10 }
 0x39a   :  { %v893_v60 = vpop.permute.xlu1 %892 }
 0x39e   :  { %v891_v63 = vpop.permute.xlu1 %890 }
 0x3a0   :  { %v2855_v54 = vpop.eup %2854 }
 0x3a1   :  { %v666_v55 = vmul.f32 %v2855_v54, %v2851_v46 }
 0x3a3   :  { %2712 = vmatmul.mubr.msk.f32.vlgmr.msra.gmra.mxu1 %vm417_vm2, %v666_v55 }
 0x3a4   :  { %2720 = vmatpush3.msra.mxu1 %v3284_v56  ;;  %2721 = vmatprep.mubr.msk.f32.mxu1 %vm3083_vm1, %v3082_v10 }
 0x3a5   :  { %2729 = vmatprep.subr.mxu1 %v3082_v10 }
 0x3ef   :  { %v574_v57 = vpop.f32.mrf.mxu1 }
 0x3f0   :  { %2722 = vmatmul.mubr.msk.f32.vlgmr.msra.gmra.mxu1 %vm417_vm2, %v574_v57 }
 0x3f1   :  { %2730 = vmatpush3.msra.mxu1 %v980_v58  ;;  %v2703_v59 = vpop.f32.mrf.mxu1  ;;  %2731 = vmatprep.mubr.msk.f32.mxu1 %vm3083_vm1, %v3082_v10 }
 0x3f2   :  { %2739 = vmatprep.subr.mxu1 %v3082_v10 }
 0x463   :  { %v740_v61 = vpop.f32.mrf.mxu1 }
 0x464   :  { %2717 = vmatmul.mubr.msk.f32.vlgmr.msra.gmra.mxu0 %vm417_vm2, %v740_v61 }
 0x465   :  { %2725 = vmatpush3.xpose.msk.msra.mxu0 %vm417_vm2, %v893_v60  ;;  %v2713_v62 = vpop.f32.mrf.mxu1  ;;  %2726 = vmatprep.mubr.msk.f32.mxu0 %vm3083_vm1, %v3082_v10 }
 0x466   :  { %2734 = vmatprep.subr.mxu0 %v3082_v10 }
 0x468   :  { %2727 = vmatmul.mubr.msk.f32.vlgmr.msra.gmra.mxu0 %vm417_vm2, %v891_v63 }
 0x469   :  { %2736 = vmatprep.mubr.msk.f32.mxu0 %vm3083_vm1, %v3082_v10  ;;  %2735 = vmatpush3.msra.mxu0 %v3313_v15 }
 0x46a   :  { %2744 = vmatprep.subr.mxu0 %v3082_v10 }
 0x4b0   :  { %v886_v0 = vpop.f32.mrf.mxu1 }
 0x4b2   :  { %v2723_v1 = vpop.f32.mrf.mxu1 }
 0x524   :  { %v813_v2 = vpop.f32.mrf.mxu0 }
 0x525   :  { %v887_v35 = vadd.f32 %v886_v0, %v813_v2 }
 0x526   :  { %v2718_v3 = vpop.f32.mrf.mxu0 }
 0x528   :  { %v964_v4 = vpop.f32.mrf.mxu0 }
 0x529   :  { %v968_v5 = vsel %vm417_vm2, %v964_v4, -inf }
 0x52a   :  { %969 = vmax.xlane.f32.xlu1 %v968_v5  ;;  %v2728_v6 = vpop.f32.mrf.mxu0 }
 0x53b   :  { %1218 = vrot.lane.b32.xlu1 %v3255_v29, %s3086_s23 }
 0x53f   :  { %1530 = vrot.lane.b32.xlu1 %v3234_v18, %s3084_s0 }
 0x5b3   :  { %v970_v8 = vpop.xlane.xlu1 %969 }
 0x5b4   :  { %v971_v11 = vsub.f32 %v964_v4, %v970_v8 }
 0x5b6   :  { %v972_v12 = vmul.f32 1.442695, %v971_v11 }
 0x5b8   :  { %2856 = vpow2.f32 %v972_v12 }
 0x5c5   :  { %v2857_v13 = vpop.eup %2856 }
 0x5c6   :  { %v974_v14 = vsel %vm417_vm2, %v2857_v13, 0.0 }
 0x5c7   :  { %975 = vadd.xlane.f32.xlu0 %v974_v14 }
 0x5dd   :  { %1131 = vrot.lane.b32.xlu0 %v3238_v22, %s3086_s23 }
 0x5e1   :  { %1129 = vrot.lane.b32.xlu0 %v3240_v24, %s3086_s23  ;;  %v1219_v24 = vpop.permute.xlu1 %1218 }
 0x5e5   :  { %v1531_v40 = vpop.permute.xlu1 %1530 }
 0x650   :  { %v976_v16 = vpop.xlane.xlu0 %975 }
 0x651   :  { %2858 = vrcp.f32 %v976_v16 }
 0x654   :  { %v1132_v19 = vpop.permute.xlu0 %1131 }
 0x658   :  { %v1130_v22 = vpop.permute.xlu0 %1129 }
 0x65e   :  { %v2859_v17 = vpop.eup %2858 }
 0x65f   :  { %v978_v20 = vmul.f32 %v2859_v17, %v2857_v13 }
 0x661   :  { %2732 = vmatmul.mubr.msk.f32.vlgmr.msra.gmra.mxu1 %vm417_vm2, %v978_v20 }
 0x662   :  { %2740 = vmatpush3.xpose.msk.msra.mxu1 %vm417_vm2, %v1132_v19  ;;  %2741 = vmatprep.mubr.msk.f32.mxu1 %vm3083_vm1, %v3082_v10 }
 0x663   :  { %2749 = vmatprep.subr.mxu1 %v3082_v10 }
 0x665   :  { %2742 = vmatmul.mubr.msk.f32.vlgmr.msra.gmra.mxu1 %vm417_vm2, %v1130_v22 }
 0x666   :  { %2751 = vmatprep.mubr.msk.f32.mxu1 %vm3083_vm1, %v3082_v10  ;;  %2750 = vmatpush3.msra.mxu1 %v3333_v39 }
 0x667   :  { %2759 = vmatprep.subr.mxu1 %v3082_v10 }
 0x721   :  { %v1051_v23 = vpop.f32.mrf.mxu1 }
 0x722   :  { %2737 = vmatmul.mubr.msk.f32.vlgmr.msra.gmra.mxu0 %vm417_vm2, %v1051_v23 }
 0x723   :  { %2745 = vmatpush3.msra.mxu0 %v1219_v24  ;;  %v2733_v25 = vpop.f32.mrf.mxu1  ;;  %2746 = vmatprep.mubr.msk.f32.mxu0 %vm3083_vm1, %v3082_v10 }
 0x724   :  { %2754 = vmatprep.subr.mxu0 %v3082_v10 }
 0x725   :  { %v1203_v26 = vpop.f32.mrf.mxu1 }
 0x726   :  { %v1207_v28 = vsel %vm417_vm2, %v1203_v26, -inf }
 0x727   :  { %1208 = vmax.xlane.f32.xlu0 %v1207_v28  ;;  %v2743_v29 = vpop.f32.mrf.mxu1 }
 0x7b0   :  { %v1209_v30 = vpop.xlane.xlu0 %1208 }
 0x7b1   :  { %v1210_v31 = vsub.f32 %v1203_v26, %v1209_v30 }
 0x7b3   :  { %v1211_v32 = vmul.f32 1.442695, %v1210_v31 }
 0x7b5   :  { %2860 = vpow2.f32 %v1211_v32 }
 0x7c2   :  { %v2861_v33 = vpop.eup %2860 }
 0x7c3   :  { %v1213_v34 = vsel %vm417_vm2, %v2861_v33, 0.0 }
 0x7c4   :  { %1214 = vadd.xlane.f32.xlu1 %v1213_v34 }
 0x7d5   :  { %1528 = vrot.lane.b32.xlu1 %v3236_v21, %s3084_s0 }
 0x7e2   :  { %v1124_v36 = vpop.f32.mrf.mxu0 }
 0x7e3   :  { %v1128_v37 = vadd.f32 %v1124_v36, %v887_v35 }
 0x7e4   :  { %v2738_v38 = vpop.f32.mrf.mxu0 }
 0x84d   :  { %v1215_v41 = vpop.xlane.xlu1 %1214 }
 0x84e   :  { %2862 = vrcp.f32 %v1215_v41 }
 0x851   :  { %v1529_v44 = vpop.permute.xlu1 %1528 }
 0x85b   :  { %v2863_v42 = vpop.eup %2862 }
 0x85c   :  { %v1217_v43 = vmul.f32 %v2863_v42, %v2861_v33 }
 0x85e   :  { %2747 = vmatmul.mubr.msk.f32.vlgmr.msra.gmra.mxu0 %vm417_vm2, %v1217_v43 }
 0x85f   :  { %2755 = vmatpush3.xpose.msk.msra.mxu0 %vm417_vm2, %v3234_v18  ;;  %2756 = vmatprep.mubr.msk.f32.mxu0 %vm3083_vm1, %v3082_v10 }
 0x860   :  { %2764 = vmatprep.subr.mxu0 %v3082_v10 }
 0x862   :  { %2757 = vmatmul.mubr.msk.f32.vlgmr.msra.gmra.mxu0 %vm417_vm2, %v3236_v21 }
 0x863   :  { %2765 = vmatpush3.xpose.msk.msra.mxu0 %vm417_vm2, %v1531_v40  ;;  %2766 = vmatprep.mubr.msk.f32.mxu0 %vm3083_vm1, %v3082_v10 }
 0x864   :  { %2774 = vmatprep.subr.mxu0 %v3082_v10 }
 0x866   :  { %2767 = vmatmul.mubr.msk.f32.vlgmr.msra.gmra.mxu0 %vm417_vm2, %v1529_v44 }
 0x867   :  { %2775 = vmatpush3.msra.mxu0 %v3279_v51  ;;  %2776 = vmatprep.mubr.msk.f32.mxu0 %vm3083_vm1, %v3082_v10 }
 0x868   :  { %2784 = vmatprep.subr.mxu0 %v3082_v10 }
 0x91e   :  { %v1290_v45 = vpop.f32.mrf.mxu0 }
 0x91f   :  { %2752 = vmatmul.mubr.msk.f32.vlgmr.msra.gmra.mxu1 %vm417_vm2, %v1290_v45 }
 0x920   :  { %2760 = vmatpush3.msra.mxu1 %v3253_v27  ;;  %v2748_v46 = vpop.f32.mrf.mxu0  ;;  %2761 = vmatprep.mubr.msk.f32.mxu1 %vm3083_vm1, %v3082_v10 }
 0x921   :  { %2769 = vmatprep.subr.mxu1 %v3082_v10 }
 0x922   :  { %v1440_v47 = vpop.f32.mrf.mxu0 }
 0x923   :  { %v1444_v48 = vsel %vm417_vm2, %v1440_v47, -inf }
 0x924   :  { %1445 = vmax.xlane.f32.xlu1 %v1444_v48  ;;  %v2758_v49 = vpop.f32.mrf.mxu0 }
 0x926   :  { %v1602_v50 = vpop.f32.mrf.mxu0 }
 0x927   :  { %v1606_v51 = vsel %vm417_vm2, %v1602_v50, -inf }
 0x928   :  { %1607 = vmax.xlane.f32.xlu0 %v1606_v51  ;;  %v2768_v52 = vpop.f32.mrf.mxu0 }
 0x935   :  { %1840 = vrot.lane.b32.xlu1 %v3236_v21, %s3085_s1 }
 0x9ad   :  { %v1446_v53 = vpop.xlane.xlu1 %1445 }
 0x9ae   :  { %v1447_v54 = vsub.f32 %v1440_v47, %v1446_v53  ;;  %v2578_v53 = vld [vmem:[#allocation13] ss:$0 sm:$0xff] }
 0x9b0   :  { %v1448_v55 = vmul.f32 1.442695, %v1447_v54 }
 0x9b1   :  { %v1608_v57 = vpop.xlane.xlu0 %1607 }
 0x9b2   :  { %2864 = vpow2.f32 %v1448_v55  ;;  %v1609_v58 = vsub.f32 %v1602_v50, %v1608_v57  ;;  %v2332_v57 = vld [vmem:[%s3460_s9 + $0x18] sm:$0xff] }
 0x9b4   :  { %v1610_v59 = vmul.f32 1.442695, %v1609_v58 }
 0x9b6   :  { %2866 = vpow2.f32 %v1610_v59 }
 0x9bf   :  { %v2865_v60 = vpop.eup %2864 }
 0x9c0   :  { %v1450_v61 = vsel %vm417_vm2, %v2865_v60, 0.0 }
 0x9c1   :  { %1451 = vadd.xlane.f32.xlu0 %v1450_v61  ;;  %v2329_v61 = vld [vmem:[%s3460_s9] sm:$0xff] }
 0x9c3   :  { %v2867_v62 = vpop.eup %2866 }
 0x9c4   :  { %v1612_v63 = vsel %vm417_vm2, %v2867_v62, 0.0 }
 0x9c5   :  { %1613 = vadd.xlane.f32.xlu0 %v1612_v63 }
 0x9db   :  { %1618 = vrot.lane.b32.xlu0 %v3253_v27, %s3084_s0 }
 0x9df   :  { %1842 = vrot.lane.b32.xlu0 %v3234_v18, %s3085_s1  ;;  %v1363_v0 = vpop.f32.mrf.mxu1 }
 0x9e0   :  { %v3369_v1 = vadd.f32 %v1363_v0, %v1128_v37 }
 0x9e1   :  { %v2753_v2 = vpop.f32.mrf.mxu1 }
 0x9e2   :  { %v2318_v52 = vadd.f32 %v3369_v1, %v3206_v7  ;;  %v2331_v7 = vld [vmem:[%s3460_s9 + $0x10] sm:$0xff] }
 0x9e4   :  { %v2327_v55 = vadd.f32 %v2578_v53, %v2318_v52 }
 0xa4a   :  { %v1452_v3 = vpop.xlane.xlu0 %1451 }
 0xa4b   :  { %2868 = vrcp.f32 %v1452_v3  ;;  %v2422_v3 = vld [vmem:[#allocation14 + $0x8] sm:$0xff] }
 0xa4e   :  { %v1614_v4 = vpop.xlane.xlu0 %1613 }
 0xa4f   :  { %2870 = vrcp.f32 %v1614_v4  ;;  %v2421_v4 = vld [vmem:[#allocation14] sm:$0xff] }
 0xa52   :  { %v1619_v8 = vpop.permute.xlu0 %1618 }
 0xa56   :  { %v1843_v17 = vpop.permute.xlu0 %1842 }
 0xa58   :  { %v2869_v5 = vpop.eup %2868 }
 0xa59   :  { %v1454_v6 = vmul.f32 %v2869_v5, %v2865_v60  ;;  %v2330_v60 = vld [vmem:[%s3460_s9 + $0x8] sm:$0xff] }
 0xa5b   :  { %2762 = vmatmul.mubr.msk.f32.vlgmr.msra.gmra.mxu1 %vm417_vm2, %v1454_v6  ;;  %v2579_v6 = vld [vmem:[%s3461_s10] ss:$0 sm:$0xff]  ;;  %s3040_s10 = scalar_lea.vmem %s2522_s7, 256 }
 0xa5c   :  { %v2871_v11 = vpop.eup %2870  ;;  %2770 = vmatpush3.msra.mxu1 %v1619_v8  ;;  %2771 = vmatprep.mubr.msk.f32.mxu1 %vm3083_vm1, %v3082_v10  ;;  %p3041_p12 = scmp.ne.s32.totalorder %s2522_s7, %s3040_s10  ;;  %p3046_p0 = scmp.lt.s32.totalorder %s3040_s10, %s3040_s10 }
 0xa5d   :  { %v1616_v12 = vmul.f32 %v2871_v11, %v2867_v62  ;;  %2779 = vmatprep.subr.mxu1 %v3082_v10 }
 0xa5e   :  { %p3047_p1 = por %p3046_p0, %p3045_p13 }
 0xa5f   :  { %2772 = vmatmul.mubr.msk.f32.vlgmr.msra.gmra.mxu1 %vm417_vm2, %v1616_v12 }
 0xa60   :  { %2780 = vmatpush3.msra.mxu1 %v3284_v56  ;;  %2781 = vmatprep.mubr.msk.f32.mxu1 %vm3083_vm1, %v3082_v10  ;;  %v1841_v56 = vpop.permute.xlu1 %1840  ;;  %p3048_p2 = pnand %p3047_p1, %p3041_p12 }
 0xa61   :  { %2789 = vmatprep.subr.mxu1 %v3082_v10 }
 0xb1b   :  { %v1524_v13 = vpop.f32.mrf.mxu1 }
 0xb1c   :  { %2782 = vmatmul.mubr.msk.f32.vlgmr.msra.gmra.mxu1 %vm417_vm2, %v1524_v13 }
 0xb1d   :  { %v2763_v14 = vpop.f32.mrf.mxu1  ;;  %2791 = vmatprep.mubr.msk.f32.mxu1 %vm3083_vm1, %v3082_v10 }
 0xb1f   :  { %v1690_v16 = vpop.f32.mrf.mxu1 }
 0xb20   :  { %2777 = vmatmul.mubr.msk.f32.vlgmr.msra.gmra.mxu0 %vm417_vm2, %v1690_v16 }
 0xb21   :  { %2785 = vmatpush3.xpose.msk.msra.mxu0 %vm417_vm2, %v1843_v17  ;;  %v2773_v19 = vpop.f32.mrf.mxu1  ;;  %2786 = vmatprep.mubr.msk.f32.mxu0 %vm3083_vm1, %v3082_v10 }
 0xb22   :  { %2794 = vmatprep.subr.mxu0 %v3082_v10 }
 0xb24   :  { %2787 = vmatmul.mubr.msk.f32.vlgmr.msra.gmra.mxu0 %vm417_vm2, %v1841_v56 }
 0xb25   :  { %2795 = vmatpush3.msra.mxu0 %v3313_v15  ;;  %2796 = vmatprep.mubr.msk.f32.mxu0 %vm3083_vm1, %v3082_v10 }
 0xb26   :  { %2804 = vmatprep.subr.mxu0 %v3082_v10 }
 0xbdc   :  { %v1836_v20 = vpop.f32.mrf.mxu1 }
 0xbde   :  { %v2783_v22 = vpop.f32.mrf.mxu1 }
 0xbe0   :  { %v1763_v23 = vpop.f32.mrf.mxu0 }
 0xbe1   :  { %v1837_v24 = vadd.f32 %v1836_v20, %v1763_v23 }
 0xbe2   :  { %v2778_v25 = vpop.f32.mrf.mxu0 }
 0xbe4   :  { %v1914_v26 = vpop.f32.mrf.mxu0 }
 0xbe5   :  { %v1918_v28 = vsel %vm417_vm2, %v1914_v26, -inf }
 0xbe6   :  { %1919 = vmax.xlane.f32.xlu0 %v1918_v28  ;;  %v2788_v29 = vpop.f32.mrf.mxu0 }
 0xbfc   :  { %1929 = vrot.lane.b32.xlu0 %v3253_v27, %s3085_s1 }
 0xc00   :  { %2079 = vrot.lane.b32.xlu0 %v3236_v21, %s3086_s23 }
 0xc6f   :  { %v1920_v15 = vpop.xlane.xlu0 %1919 }
 0xc70   :  { %v1921_v30 = vsub.f32 %v1914_v26, %v1920_v15 }
 0xc72   :  { %v1922_v31 = vmul.f32 1.442695, %v1921_v30 }
 0xc73   :  { %v1930_v32 = vpop.permute.xlu0 %1929 }
 0xc74   :  { %2872 = vpow2.f32 %v1922_v31  ;;  %2790 = vmatpush3.msra.mxu1 %v1930_v32 }
 0xc75   :  { %2799 = vmatprep.subr.mxu1 %v3082_v10 }
 0xc77   :  { %v2080_v38 = vpop.permute.xlu0 %2079 }
 0xc81   :  { %v2873_v33 = vpop.eup %2872 }
 0xc82   :  { %v1924_v34 = vsel %vm417_vm2, %v2873_v33, 0.0 }
 0xc83   :  { %1925 = vadd.xlane.f32.xlu1 %v1924_v34 }
 0xc94   :  { %2081 = vrot.lane.b32.xlu1 %v3234_v18, %s3086_s23 }
 0xd0c   :  { %v1926_v35 = vpop.xlane.xlu1 %1925 }
 0xd0d   :  { %2874 = vrcp.f32 %v1926_v35 }
 0xd10   :  { %v2082_v21 = vpop.permute.xlu1 %2081 }
 0xd1a   :  { %v2875_v36 = vpop.eup %2874 }
 0xd1b   :  { %v1928_v37 = vmul.f32 %v2875_v36, %v2873_v33 }
 0xd1d   :  { %2792 = vmatmul.mubr.msk.f32.vlgmr.msra.gmra.mxu1 %vm417_vm2, %v1928_v37 }
 0xd1e   :  { %2800 = vmatpush3.xpose.msk.msra.mxu1 %vm417_vm2, %v2082_v21  ;;  %2801 = vmatprep.mubr.msk.f32.mxu1 %vm3083_vm1, %v3082_v10 }
 0xd1f   :  { %2809 = vmatprep.subr.mxu1 %v3082_v10 }
 0xd21   :  { %2802 = vmatmul.mubr.msk.f32.vlgmr.msra.gmra.mxu1 %vm417_vm2, %v2080_v38 }
 0xd22   :  { %2810 = vmatpush3.msra.mxu1 %v3333_v39  ;;  %2811 = vmatprep.mubr.msk.f32.mxu1 %vm3083_vm1, %v3082_v10 }
 0xd23   :  { %2825 = vmatprep.subr.mxu1 %v2422_v3 }
 0xddd   :  { %v2001_v18 = vpop.f32.mrf.mxu1 }
 0xdde   :  { %2797 = vmatmul.mubr.msk.f32.vlgmr.msra.gmra.mxu0 %vm417_vm2, %v2001_v18 }
 0xddf   :  { %v2793_v40 = vpop.f32.mrf.mxu1  ;;  %2806 = vmatprep.mubr.msk.f32.mxu0 %vm3083_vm1, %v3082_v10 }
 0xde1   :  { %v2153_v41 = vpop.f32.mrf.mxu1 }
 0xde2   :  { %v2157_v42 = vsel %vm417_vm2, %v2153_v41, -inf }
 0xde3   :  { %2158 = vmax.xlane.f32.xlu0 %v2157_v42  ;;  %v2803_v43 = vpop.f32.mrf.mxu1 }
 0xdf9   :  { %2168 = vrot.lane.b32.xlu0 %v3253_v27, %s3086_s23 }
 0xe6c   :  { %v2159_v44 = vpop.xlane.xlu0 %2158 }
 0xe6d   :  { %v2160_v39 = vsub.f32 %v2153_v41, %v2159_v44 }
 0xe6f   :  { %v2161_v45 = vmul.f32 1.442695, %v2160_v39 }
 0xe70   :  { %v2169_v46 = vpop.permute.xlu0 %2168 }
 0xe71   :  { %2876 = vpow2.f32 %v2161_v45  ;;  %2805 = vmatpush3.msra.mxu0 %v2169_v46 }
 0xe72   :  { %2814 = vmatprep.subr.mxu0 %v2332_v57 }
 0xe7e   :  { %v2877_v47 = vpop.eup %2876 }
 0xe7f   :  { %v2163_v48 = vsel %vm417_vm2, %v2877_v47, 0.0 }
 0xe80   :  { %2164 = vadd.xlane.f32.xlu1 %v2163_v48 }
 0xe9e   :  { %v2074_v49 = vpop.f32.mrf.mxu0 }
 0xe9f   :  { %v2078_v10 = vadd.f32 %v2074_v49, %v1837_v24 }
 0xea0   :  { %v2798_v50 = vpop.f32.mrf.mxu0 }
 0xf09   :  { %v2165_v51 = vpop.xlane.xlu1 %2164 }
 0xf0a   :  { %2878 = vrcp.f32 %v2165_v51 }
 0xf17   :  { %v2879_v27 = vpop.eup %2878 }
 0xf18   :  { %v2167_v54 = vmul.f32 %v2879_v27, %v2877_v47 }
 0xf1a   :  { %2807 = vmatmul.mubr.msk.f32.vlgmr.msra.gmra.mxu0 %vm417_vm2, %v2167_v54 }
 0xf1b   :  { %2822 = vmatprep.mubr.msk.f32.mxu0 %vm159_vm0, %v2327_v55  ;;  %2815 = vmatpush3.msra.mxu0 %v2332_v57 }
 0xf1c   :  { %2816 = vmatprep.subr.mxu0 %v2331_v7 }
 0xf1d   :  { %2817 = vmatpush3.msra.mxu0 %v2331_v7 }
 0xf1e   :  { %2818 = vmatprep.subr.mxu0 %v2330_v60 }
 0xf1f   :  { %2819 = vmatpush3.msra.mxu0 %v2330_v60 }
 0xf20   :  { %2820 = vmatprep.subr.mxu0 %v2329_v61 }
 0xf21   :  { %2821 = vmatpush3.msra.mxu0 %v2329_v61 }
 0xfda   :  { %v2240_v58 = vpop.f32.mrf.mxu0 }
 0xfdb   :  { %2812 = vmatmul.mubr.msk.f32.vlgmr.msra.gmra.mxu1 %vm417_vm2, %v2240_v58 }
 0xfdc   :  { %v2808_v59 = vpop.f32.mrf.mxu0  ;;  %2826 = vmatpush3.msra.mxu1 %v2422_v3 }
 0xfdd   :  { %2827 = vmatprep.subr.mxu1 %v2421_v4 }
 0xfde   :  { %2828 = vmatpush3.msra.mxu1 %v2421_v4 }
0x109b   :  { %v2313_v62 = vpop.f32.mrf.mxu1 }
0x109c   :  { %v2317_v63 = vadd.f32 %v2313_v62, %v2078_v10 }
0x109d   :  { %v2813_v0 = vpop.f32.mrf.mxu1 }
0x109e   :  { %v2319_v1 = vadd.f32 %v2317_v63, %v3214_v9  ;;  %v2582_v9 = vld [vmem:[%s3463_s12] ss:$0 sm:$0xff] }
0x10a0   :  { %v2328_v2 = vadd.f32 %v2578_v53, %v2319_v1 }
0x10a2   :  { %2823 = vmatmul.mubr.msk.f32.vlgmr.msra.gmra.mxu0 %vm159_vm0, %v2328_v2 }
0x1162   :  { %v2824_v5 = vpop.f32.mrf.mxu0 }
0x1163   :  { %v2418_v12 = vadd.f32 %v2824_v5, %v2579_v6 }
0x1164   :  { %v2412_v8 = vpop.f32.mrf.mxu0 }
0x1165   :  { %v2413_v11 = vadd.f32 %v2579_v6, %v2412_v8 }
0x1167   :  { %2829 = vmatprep.mubr.msk.f32.mxu1 %vm2430_vm3, %v2413_v11 }
0x1168   :  { %2830 = vmatmul.mubr.msk.f32.vlgmr.msra.gmra.mxu1 %vm2430_vm3, %v2418_v12 }
0x1228   :  { %v2831_v13 = vpop.f32.mrf.mxu1 }
0x1229   :  { %v2509_v14 = vadd.f32 %v2831_v13, %v2582_v9 }
0x122a   :  { %v2503_v16 = vpop.f32.mrf.mxu1 }
0x122b   :  { %v2513_v17 = vadd.f32 %v2509_v14, %v2328_v2  ;;  %v2504_v19 = vadd.f32 %v2582_v9, %v2503_v16 }
0x122d   :  { %2515 = vst.msk [vmem:[#allocation16 + $0x8] sm:$0xff] %vm159_vm0, %v2513_v17  ;;  %v2512_v56 = vadd.f32 %v2504_v19, %v2327_v55 }
0x122f   :  { %2514 = vst.msk [vmem:[#allocation16] sm:$0xff] %vm159_vm0, %v2512_v56 }
0x1230   :  { %3051 = shalt.err (!%p3048_p2)
}
0x1231   :  { %2527 = dma.vmem_to_hbm [thread:$0]  %s2522_s7, 256, %s3464_s13, [#allocation4], %s3073_s28, %s3073_s28, %s3074_s29  }
0x1232   :  { %3070 = dma.done.wait [#allocation4], 256  }
0x1233   :  { %3071 = vsyncadd [#allocation4], 4294967040 }
0x1234   :  { %2531 = vsyncpa [#allocation3], 1 }
0x1235   :  { %2532 = vsyncpa [#allocation6], 1 }
0x1236   :  { %2533 = vsyncpa [#allocation9], 1 }
0x1237   :  { %2534 = vsyncpa [#allocation12], 1 }
0x1238   :  { %2535 = vsyncpa [#allocation15], 1 }
0x1239   :  { %2536 = vsyncpa [#allocation4], 1 }

</bundles_post_ra>
